<compile_context>
chip_gen: v7x
topology: tpu7x:2x2x1
jax: 0.10.0
libtpu: 0.0.40
codegen_flags: <defaults>
</compile_context>

<pallas_src>
import functools

import jax
import jax.numpy as jnp
from jax import lax
from jax.experimental import pallas as pl
from jax.experimental.pallas import tpu as pltpu

_BN_EPS = 1e-5
_VMEM_LIMIT = 48 * 1024 * 1024       # valid on v5e/v6e (128 MiB) and v7x (64 MiB)


def _round_up(x, m):
    return ((x + m - 1) // m) * m


def _largest_divisor_leq(n, target):
    target = max(1, min(n, target))
    for d in range(target, 0, -1):
        if n % d == 0:
            return d
    return 1


def _pick_strip_rows(OH, OW, Wq, Cin, Cout, K, stride):
    """Largest divisor of OH whose strip fits a conservative VMEM budget."""
    in_budget = 4 << 20       # bf16 input slab (double-buffered by Pallas)
    acc_budget = 8 << 20      # f32 accumulator
    best = 1
    for ohb in range(1, OH + 1):
        if OH % ohb:
            continue
        rq = ohb + (K - 1) // stride
        in_bytes = stride * stride * rq * Wq * max(Cin, 128) * 2   # lane padding
        acc_bytes = ohb * OW * Cout * 4
        if in_bytes <= in_budget and acc_bytes <= acc_budget:
            best = ohb
    return best


def _pick_images_per_block(N, OH, OW, Cp):
    budget = 12 << 20
    per_img = OH * OW * Cp * (2 + 4 + 4)        # h2 bf16 + skip (<=f32) + out f32
    return _largest_divisor_leq(N, max(1, budget // max(per_img, 1)))


# ---------------------------------------------------------------------------
# Stage 1: fused conv1 (+ conv3 along Cout) + per-strip BN partial statistics.
# Grid = (N, S1); every axis "parallel".  Input strips are pre-de-interleaved
# by the wrapper: phase p = (kh % s) * s + (kw % s) occupies rows [p*Rq, (p+1)*Rq),
# so every conv tap is one contiguous slice + one MXU matmul.
# ---------------------------------------------------------------------------
def _conv_bnstats_kernel(x_ref, w_ref, b_ref, y_ref, st_ref, *,
                         K, stride, OHb, OW, Rq):
    Cin = x_ref.shape[-1]
    Cout = y_ref.shape[-1]
    M = OHb * OW

    x = x_ref[...]                                       # (s*s*Rq, Wq, Cin) bf16
    acc = jnp.zeros((M, Cout), jnp.float32) + b_ref[...]  # bias broadcast (hoisted)
    for kh in range(K):
        for kw in range(K):
            p = (kh % stride) * stride + (kw % stride)
            r0 = p * Rq + kh // stride
            c0 = kw // stride
            win = lax.slice(x, (r0, c0, 0), (r0 + OHb, c0 + OW, Cin))
            acc = acc + jnp.dot(win.reshape(M, Cin), w_ref[kh * K + kw],
                                preferred_element_type=jnp.float32)

    y_ref[...] = acc.reshape(OHb, OW, Cout).astype(y_ref.dtype)
    st_ref[...] = jnp.concatenate(
        [jnp.sum(acc, axis=0, keepdims=True),
         jnp.sum(acc * acc, axis=0, keepdims=True)], axis=0)


def conv_bn_stats_pallas(x_strips, w, b, *, K, stride, OHb, OW, S1, N):
    NS, rows_in, Wq, Cin = x_strips.shape
    Cout = w.shape[-1]
    OH = S1 * OHb
    Rq = OHb + (K - 1) // stride
    kernel = functools.partial(_conv_bnstats_kernel, K=K, stride=stride,
                               OHb=OHb, OW=OW, Rq=Rq)
    return pl.pallas_call(
        kernel,
        grid=(N, S1),
        in_specs=[
            pl.BlockSpec((None, rows_in, Wq, Cin), lambda n, t: (n * S1 + t, 0, 0, 0)),
            pl.BlockSpec((K * K, Cin, Cout), lambda n, t: (0, 0, 0)),
            pl.BlockSpec((1, Cout), lambda n, t: (0, 0)),
        ],
        out_specs=[
            pl.BlockSpec((None, OHb, OW, Cout), lambda n, t: (n, t, 0, 0)),
            pl.BlockSpec((None, 2, Cout), lambda n, t: (n * S1 + t, 0, 0)),
        ],
        out_shape=[
            jax.ShapeDtypeStruct((N, OH, OW, Cout), jnp.bfloat16),
            jax.ShapeDtypeStruct((N * S1, 2, Cout), jnp.float32),   # per-strip sum/sumsq
        ],
        compiler_params=pltpu.CompilerParams(
            dimension_semantics=("parallel", "parallel"),
            vmem_limit_bytes=_VMEM_LIMIT),
    )(x_strips, w, b)


# ---------------------------------------------------------------------------
# Stage 2: bn1 apply + ReLU + in-register zero padding fused into conv2,
# plus per-image BN2 partial statistics.  Reads ONLY the branch-1 channel
# block of y (channel-blocked BlockSpec).
# ---------------------------------------------------------------------------
def _bn_relu_conv_bnstats_kernel(y1_ref, s1_ref, t1_ref, w_ref, b_ref,
                                 h2_ref, st_ref, *, K, pad, OH, OW):
    Cp = y1_ref.shape[-1]
    M = OH * OW

    y1 = y1_ref[...].astype(jnp.float32)
    h1 = jnp.maximum(y1 * s1_ref[...].reshape(1, 1, Cp)
                     + t1_ref[...].reshape(1, 1, Cp), 0.0).astype(jnp.bfloat16)
    # 'same' zero padding built in registers (no extra HBM pass, single layout)
    zc = jnp.zeros((OH, pad, Cp), jnp.bfloat16)
    h1w = jnp.concatenate([zc, h1, zc], axis=1)
    zr = jnp.zeros((pad, OW + 2 * pad, Cp), jnp.bfloat16)
    h1p = jnp.concatenate([zr, h1w, zr], axis=0)          # (OH+2p, OW+2p, Cp)

    acc = jnp.zeros((M, Cp), jnp.float32) + b_ref[...]
    for kh in range(K):
        for kw in range(K):
            win = lax.slice(h1p, (kh, kw, 0), (kh + OH, kw + OW, Cp))
            acc = acc + jnp.dot(win.reshape(M, Cp), w_ref[kh * K + kw],
                                preferred_element_type=jnp.float32)

    h2_ref[...] = acc.reshape(OH, OW, Cp).astype(h2_ref.dtype)
    st_ref[...] = jnp.concatenate(
        [jnp.sum(acc, axis=0, keepdims=True),
         jnp.sum(acc * acc, axis=0, keepdims=True)], axis=0)


def conv2_fused_pallas(y, scale1, shift1, w2, b2, *, K, pad, OH, OW, Cp):
    N = y.shape[0]
    kernel = functools.partial(_bn_relu_conv_bnstats_kernel, K=K, pad=pad,
                               OH=OH, OW=OW)
    vec = pl.BlockSpec((1, Cp), lambda n: (0, 0))
    return pl.pallas_call(
        kernel,
        grid=(N,),
        in_specs=[pl.BlockSpec((None, OH, OW, Cp), lambda n: (n, 0, 0, 0)),
                  vec, vec,
                  pl.BlockSpec((K * K, Cp, Cp), lambda n: (0, 0, 0)),
                  vec],
        out_specs=[pl.BlockSpec((None, OH, OW, Cp), lambda n: (n, 0, 0, 0)),
                   pl.BlockSpec((None, 2, Cp), lambda n: (n, 0, 0))],
        out_shape=[jax.ShapeDtypeStruct((N, OH, OW, Cp), jnp.bfloat16),
                   jax.ShapeDtypeStruct((N, 2, Cp), jnp.float32)],
        compiler_params=pltpu.CompilerParams(
            dimension_semantics=("parallel",),
            vmem_limit_bytes=_VMEM_LIMIT),
    )(y, scale1, shift1, w2, b2)


# ---------------------------------------------------------------------------
# Stage 3: fused epilogue  out = relu( bn2(h2) + bn3(skip) )  (bn3 = identity
# for the non-diff branch).  Several images per grid step; the skip tensor is
# the branch-3 channel block of y (or the channel-padded input x).
# ---------------------------------------------------------------------------
def _bn_add_relu_kernel(h2_ref, sk_ref, s2_ref, t2_ref, s3_ref, t3_ref, o_ref):
    Cp = o_ref.shape[-1]
    s2 = s2_ref[...].reshape(1, 1, 1, Cp)
    t2 = t2_ref[...].reshape(1, 1, 1, Cp)
    s3 = s3_ref[...].reshape(1, 1, 1, Cp)
    t3 = t3_ref[...].reshape(1, 1, 1, Cp)
    h2 = h2_ref[...].astype(jnp.float32)
    sk = sk_ref[...].astype(jnp.float32)
    o_ref[...] = jnp.maximum(h2 * s2 + t2 + sk * s3 + t3, 0.0).astype(o_ref.dtype)


def bn_add_relu_pallas(h2, skip, s2, t2, s3, t3, *, Cp, skip_block, nimg,
                       out_dtype=jnp.float32):
    N, OH, OW, _ = h2.shape
    vec = pl.BlockSpec((1, Cp), lambda b: (0, 0))
    return pl.pallas_call(
        _bn_add_relu_kernel,
        grid=(N // nimg,),
        in_specs=[pl.BlockSpec((nimg, OH, OW, Cp), lambda b: (b, 0, 0, 0)),
                  pl.BlockSpec((nimg, OH, OW, Cp), lambda b: (b, 0, 0, skip_block)),
                  vec, vec, vec, vec],
        out_specs=pl.BlockSpec((nimg, OH, OW, Cp), lambda b: (b, 0, 0, 0)),
        out_shape=jax.ShapeDtypeStruct((N, OH, OW, Cp), out_dtype),
        compiler_params=pltpu.CompilerParams(dimension_semantics=("parallel",)),
    )(h2, skip, s2, t2, s3, t3)


# ---------------------------------------------------------------------------
# BatchNorm helpers (wrapper side): per-channel scale/shift from partial sums.
# ---------------------------------------------------------------------------
def _bn_scale_shift(sums, count, gamma, beta, Cp):
    """sums: (2, Cp) = (sum, sumsq) over `count` samples (lane-padded with 0)."""
    C = gamma.shape[0]
    mean = sums[0] / count
    # Biased variance (PyTorch training-mode normalization).
    # TODO(synk): E[x^2]-E[x]^2 in f32 loses precision at very large count /
    # magnitude; use a mean-subtracted second pass if bit-level parity matters.
    var = sums[1] / count - mean * mean
    inv = lax.rsqrt(jnp.maximum(var, 0.0) + _BN_EPS)
    g = jnp.zeros((Cp,), jnp.float32).at[:C].set(gamma.astype(jnp.float32))
    b = jnp.zeros((Cp,), jnp.float32).at[:C].set(beta.astype(jnp.float32))
    scale = inv * g
    shift = b - mean * scale
    return scale.reshape(1, Cp), shift.reshape(1, Cp)


# ---------------------------------------------------------------------------
# Parameters (conv weights stored in (K, K, Cin, Cout) layout; a PyTorch
# (Cout, Cin, K, K) weight maps via w.permute(2, 3, 1, 0)).
# ---------------------------------------------------------------------------
def init_res2d_params(key, input_channels, output_channels, shape=3):
    ks = jax.random.split(key, 12)
    Cin, Cout, K = input_channels, output_channels, shape

    def conv_w(k, cin, cout):
        return 0.1 * jax.random.normal(k, (K, K, cin, cout), jnp.float32)

    return {
        "w1": conv_w(ks[0], Cin, Cout),
        "b1": 0.1 * jax.random.normal(ks[1], (Cout,), jnp.float32),
        "g1": 1.0 + 0.1 * jax.random.normal(ks[2], (Cout,), jnp.float32),
        "be1": 0.1 * jax.random.normal(ks[3], (Cout,), jnp.float32),
        "w2": conv_w(ks[4], Cout, Cout),
        "b2": 0.1 * jax.random.normal(ks[5], (Cout,), jnp.float32),
        "g2": 1.0 + 0.1 * jax.random.normal(ks[6], (Cout,), jnp.float32),
        "be2": 0.1 * jax.random.normal(ks[7], (Cout,), jnp.float32),
        "w3": conv_w(ks[8], Cin, Cout),
        "b3": 0.1 * jax.random.normal(ks[9], (Cout,), jnp.float32),
        "g3": 1.0 + 0.1 * jax.random.normal(ks[10], (Cout,), jnp.float32),
        "be3": 0.1 * jax.random.normal(ks[11], (Cout,), jnp.float32),
    }


# ---------------------------------------------------------------------------
# Res_2d forward
# ---------------------------------------------------------------------------
def res2d_forward(x_nchw, params, *, stride=2):
    w1 = params["w1"]
    K, _, Cin, C = w1.shape
    pad = K // 2
    diff = (stride != 1) or (Cin != C)
    Cp = _round_up(C, 128)          # lane-dense per-branch channel block
    n_br = 2 if diff else 1
    Ca = n_br * Cp

    x = jnp.transpose(x_nchw, (0, 2, 3, 1)).astype(jnp.float32)     # NCHW -> NHWC
    N, H, W, _ = x.shape
    OH = (H + 2 * pad - K) // stride + 1
    OW = (W + 2 * pad - K) // stride + 1
    count = float(N * OH * OW)
    s = stride

    # ---- stage-1 input prep (wrapper / XLA): zero 'same' padding, stride-phase
    # de-interleave and halo-duplicated row strips built once, so the kernel's
    # windows are plain contiguous slices. -------------------------------------
    Hp = _round_up(max(H + 2 * pad, (OH - 1) * s + K), s)
    Wp = _round_up(max(W + 2 * pad, (OW - 1) * s + K), s)
    Wq = Wp // s
    OHb = _pick_strip_rows(OH, OW, Wq, Cin, Ca, K, s)
    S1 = OH // OHb
    Rq = OHb + (K - 1) // s

    xp = jnp.pad(x, ((0, 0), (pad, Hp - H - pad), (pad, Wp - W - pad), (0, 0)))
    xp = xp.astype(jnp.bfloat16)
    phase_imgs = [xp[:, ph::s, pw::s, :] for ph in range(s) for pw in range(s)]
    strips = []
    for t in range(S1):
        slabs = [pi[:, t * OHb: t * OHb + Rq] for pi in phase_imgs]
        strips.append(jnp.concatenate(slabs, axis=1))        # (N, s*s*Rq, Wq, Cin)
    x_strips = jnp.stack(strips, axis=1).reshape(N * S1, s * s * Rq, Wq, Cin)

    # Fused conv1 (+ conv3) weights, per-branch zero-padded to Cp lanes.
    w_a = jnp.zeros((K, K, Cin, Ca), jnp.float32).at[..., :C].set(params["w1"])
    b_a = jnp.zeros((Ca,), jnp.float32).at[:C].set(params["b1"])
    if diff:
        w_a = w_a.at[..., Cp:Cp + C].set(params["w3"])
        b_a = b_a.at[Cp:Cp + C].set(params["b3"])
    w_a = w_a.reshape(K * K, Cin, Ca).astype(jnp.bfloat16)
    b_a = b_a.reshape(1, Ca)

    # ---- stage 1: conv1 (+conv3) + per-strip BN partial stats -----------------
    y, stats_a = conv_bn_stats_pallas(x_strips, w_a, b_a, K=K, stride=s,
                                      OHb=OHb, OW=OW, S1=S1, N=N)
    sums_a = jnp.sum(stats_a, axis=0)                         # (2, Ca)
    scale1, shift1 = _bn_scale_shift(sums_a[:, :Cp], count,
                                     params["g1"], params["be1"], Cp)

    # ---- stage 2: bn1 + ReLU + pad fused into conv2 (+ BN2 partial stats) -----
    w2 = jnp.zeros((K, K, Cp, Cp), jnp.float32).at[:, :, :C, :C].set(params["w2"])
    w2 = w2.reshape(K * K, Cp, Cp).astype(jnp.bfloat16)
    b2 = jnp.zeros((1, Cp), jnp.float32).at[0, :C].set(params["b2"])
    h2, stats2 = conv2_fused_pallas(y, scale1, shift1, w2, b2,
                                    K=K, pad=pad, OH=OH, OW=OW, Cp=Cp)
    scale2, shift2 = _bn_scale_shift(jnp.sum(stats2, axis=0), count,
                                     params["g2"], params["be2"], Cp)

    # ---- stage 3: fused bn2 + bn3(skip) + add + ReLU ---------------------------
    if diff:
        skip, skip_block = y, 1                               # branch-3 channel block
        scale3, shift3 = _bn_scale_shift(sums_a[:, Cp:], count,
                                         params["g3"], params["be3"], Cp)
    else:
        skip = jnp.pad(x, ((0, 0), (0, 0), (0, 0), (0, Cp - C)))
        skip_block = 0
        scale3 = jnp.ones((1, Cp), jnp.float32)
        shift3 = jnp.zeros((1, Cp), jnp.float32)

    nimg = _pick_images_per_block(N, OH, OW, Cp)
    out = bn_add_relu_pallas(h2, skip, scale2, shift2, scale3, shift3,
                             Cp=Cp, skip_block=skip_block, nimg=nimg,
                             out_dtype=jnp.float32)   # bf16 OK if consumers accept
    return jnp.transpose(out[..., :C], (0, 3, 1, 2))          # NHWC -> NCHW


# ---------------------------------------------------------------------------
# Pure-JAX reference (f32) for correctness checking.
# ---------------------------------------------------------------------------
def _res2d_reference(x_nchw, params, *, stride):
    K = params["w1"].shape[0]
    pad = K // 2
    Cin, C = params["w1"].shape[2], params["w1"].shape[3]
    diff = (stride != 1) or (Cin != C)
    x = jnp.transpose(x_nchw, (0, 2, 3, 1)).astype(jnp.float32)

    def conv(h, w, b, s):
        y = lax.conv_general_dilated(h, w, (s, s), ((pad, pad), (pad, pad)),
                                     dimension_numbers=("NHWC", "HWIO", "NHWC"))
        return y + b.reshape(1, 1, 1, -1)

    def bn(h, g, b):
        mean = jnp.mean(h, axis=(0, 1, 2))
        var = jnp.var(h, axis=(0, 1, 2))
        return (h - mean) * lax.rsqrt(var + _BN_EPS) * g + b

    h1 = jax.nn.relu(bn(conv(x, params["w1"], params["b1"], stride),
                        params["g1"], params["be1"]))
    h2 = bn(conv(h1, params["w2"], params["b2"], 1), params["g2"], params["be2"])
    if diff:
        sk = bn(conv(x, params["w3"], params["b3"], stride),
                params["g3"], params["be3"])
    else:
        sk = x
    return jnp.transpose(jax.nn.relu(h2 + sk), (0, 3, 1, 2))


if __name__ == "__main__":
    key = jax.random.PRNGKey(0)
    k1, k2, k3, k4 = jax.random.split(key, 4)
    fwd = jax.jit(res2d_forward, static_argnames=("stride",))

    # Case 1: downsampling block (diff branch: conv_3 + bn_3), stride=2.
    N, Cin, H, W, Cout, stride = 2, 4, 16, 16, 8, 2
    x = jax.random.normal(k1, (N, Cin, H, W), jnp.float32)
    params = init_res2d_params(k2, Cin, Cout, shape=3)
    out = jax.block_until_ready(fwd(x, params, stride=stride))
    ref = _res2d_reference(x, params, stride=stride)
    OHe = (H + 2 - 3) // stride + 1
    assert out.shape == (N, Cout, OHe, OHe), out.shape
    assert bool(jnp.all(out >= 0.0)) and bool(jnp.all(jnp.isfinite(out)))
    err = float(jnp.max(jnp.abs(out - ref)))
    assert err < 0.3, err       # bf16 conv path vs f32 reference

    # Case 2: identity-skip block (stride=1, Cin == Cout).
    N2, C2, H2, W2 = 2, 8, 16, 16
    x2 = jax.random.normal(k3, (N2, C2, H2, W2), jnp.float32)
    params2 = init_res2d_params(k4, C2, C2, shape=3)
    out2 = jax.block_until_ready(fwd(x2, params2, stride=1))
    ref2 = _res2d_reference(x2, params2, stride=1)
    assert out2.shape == (N2, C2, H2, W2), out2.shape
    assert bool(jnp.all(out2 >= 0.0)) and bool(jnp.all(jnp.isfinite(out2)))
    err2 = float(jnp.max(jnp.abs(out2 - ref2)))
    assert err2 < 0.3, err2

    print("KERNEL_OK")
</pallas_src>

<mosaic_0001>
module attributes {stable_mosaic.version = 11 : i64} {
  func.func @_conv_bnstats_kernel(%arg0: i32, %arg1: i32, %arg2: memref<1x36x9x4xbf16, #tpu.memory_space<vmem>>, %arg3: memref<9x4x256xbf16, #tpu.memory_space<vmem>>, %arg4: memref<1x256xf32, #tpu.memory_space<vmem>>, %arg5: memref<1x8x8x256xbf16, #tpu.memory_space<vmem>>, %arg6: memref<1x2x256xf32, #tpu.memory_space<vmem>>) attributes {dimension_semantics = [#tpu.dimension_semantics<parallel>, #tpu.dimension_semantics<parallel>], iteration_bounds = array<i64: 2, 1>, scalar_prefetch = 0 : i64, scratch_operands = 0 : i64, tpu.core_type = #tpu.core_type<tc>, window_params = [{transform_indices = @transform_0, window_bounds = array<i64: 1, 36, 9, 4>}, {pipeline_mode = #tpu.pipeline_mode<synchronous>, transform_indices = @transform_1, window_bounds = array<i64: 9, 4, 256>}, {pipeline_mode = #tpu.pipeline_mode<synchronous>, transform_indices = @transform_2, window_bounds = array<i64: 1, 256>}, {transform_indices = @transform_3, window_bounds = array<i64: 1, 8, 8, 256>}, {transform_indices = @transform_4, window_bounds = array<i64: 1, 2, 256>}]} {
    %c0 = arith.constant 0 : index
    %c0_0 = arith.constant 0 : index
    %c0_1 = arith.constant 0 : index
    %c0_2 = arith.constant 0 : index
    %0 = vector.load %arg2[%c0, %c0_0, %c0_1, %c0_2] : memref<1x36x9x4xbf16, #tpu.memory_space<vmem>>, vector<1x36x9x4xbf16>
    %1 = vector.shape_cast %0 : vector<1x36x9x4xbf16> to vector<36x9x4xbf16>
    %cst = arith.constant 0.000000e+00 : f32
    %2 = vector.broadcast %cst : f32 to vector<64x256xf32>
    %c0_3 = arith.constant 0 : index
    %c0_4 = arith.constant 0 : index
    %3 = vector.load %arg4[%c0_3, %c0_4] : memref<1x256xf32, #tpu.memory_space<vmem>>, vector<1x256xf32>
    %4 = vector.broadcast %3 : vector<1x256xf32> to vector<64x256xf32>
    %5 = arith.addf %2, %4 : vector<64x256xf32>
    %6 = vector.extract_strided_slice %1 {offsets = [0, 0, 0], sizes = [8, 8, 4], strides = [1, 1, 1]} : vector<36x9x4xbf16> to vector<8x8x4xbf16>
    %7 = vector.shape_cast %6 : vector<8x8x4xbf16> to vector<64x4xbf16>
    %c0_5 = arith.constant 0 : index
    %c0_6 = arith.constant 0 : index
    %c0_7 = arith.constant 0 : index
    %8 = vector.load %arg3[%c0_5, %c0_6, %c0_7] : memref<9x4x256xbf16, #tpu.memory_space<vmem>>, vector<1x4x256xbf16>
    %9 = vector.shape_cast %8 : vector<1x4x256xbf16> to vector<4x256xbf16>
    %cst_8 = arith.constant dense<0.000000e+00> : vector<64x256xf32>
    %10 = tpu.matmul %7, %9, %cst_8 {dimension_numbers = #tpu.dot_dimension_numbers<[1], [0], [0], [1], [0, 0, 1, 1], [], []>} : vector<64x4xbf16>, vector<4x256xbf16>, vector<64x256xf32> -> vector<64x256xf32>
    %11 = arith.addf %5, %10 : vector<64x256xf32>
    %12 = vector.extract_strided_slice %1 {offsets = [9, 0, 0], sizes = [8, 8, 4], strides = [1, 1, 1]} : vector<36x9x4xbf16> to vector<8x8x4xbf16>
    %13 = vector.shape_cast %12 : vector<8x8x4xbf16> to vector<64x4xbf16>
    %c1 = arith.constant 1 : index
    %c0_9 = arith.constant 0 : index
    %c0_10 = arith.constant 0 : index
    %14 = vector.load %arg3[%c1, %c0_9, %c0_10] : memref<9x4x256xbf16, #tpu.memory_space<vmem>>, vector<1x4x256xbf16>
    %15 = vector.shape_cast %14 : vector<1x4x256xbf16> to vector<4x256xbf16>
    %cst_11 = arith.constant dense<0.000000e+00> : vector<64x256xf32>
    %16 = tpu.matmul %13, %15, %cst_11 {dimension_numbers = #tpu.dot_dimension_numbers<[1], [0], [0], [1], [0, 0, 1, 1], [], []>} : vector<64x4xbf16>, vector<4x256xbf16>, vector<64x256xf32> -> vector<64x256xf32>
    %17 = arith.addf %11, %16 : vector<64x256xf32>
    %18 = vector.extract_strided_slice %1 {offsets = [0, 1, 0], sizes = [8, 8, 4], strides = [1, 1, 1]} : vector<36x9x4xbf16> to vector<8x8x4xbf16>
    %19 = vector.shape_cast %18 : vector<8x8x4xbf16> to vector<64x4xbf16>
    %c2 = arith.constant 2 : index
    %c0_12 = arith.constant 0 : index
    %c0_13 = arith.constant 0 : index
    %20 = vector.load %arg3[%c2, %c0_12, %c0_13] : memref<9x4x256xbf16, #tpu.memory_space<vmem>>, vector<1x4x256xbf16>
    %21 = vector.shape_cast %20 : vector<1x4x256xbf16> to vector<4x256xbf16>
    %cst_14 = arith.constant dense<0.000000e+00> : vector<64x256xf32>
    %22 = tpu.matmul %19, %21, %cst_14 {dimension_numbers = #tpu.dot_dimension_numbers<[1], [0], [0], [1], [0, 0, 1, 1], [], []>} : vector<64x4xbf16>, vector<4x256xbf16>, vector<64x256xf32> -> vector<64x256xf32>
    %23 = arith.addf %17, %22 : vector<64x256xf32>
    %24 = vector.extract_strided_slice %1 {offsets = [18, 0, 0], sizes = [8, 8, 4], strides = [1, 1, 1]} : vector<36x9x4xbf16> to vector<8x8x4xbf16>
    %25 = vector.shape_cast %24 : vector<8x8x4xbf16> to vector<64x4xbf16>
    %c3 = arith.constant 3 : index
    %c0_15 = arith.constant 0 : index
    %c0_16 = arith.constant 0 : index
    %26 = vector.load %arg3[%c3, %c0_15, %c0_16] : memref<9x4x256xbf16, #tpu.memory_space<vmem>>, vector<1x4x256xbf16>
    %27 = vector.shape_cast %26 : vector<1x4x256xbf16> to vector<4x256xbf16>
    %cst_17 = arith.constant dense<0.000000e+00> : vector<64x256xf32>
    %28 = tpu.matmul %25, %27, %cst_17 {dimension_numbers = #tpu.dot_dimension_numbers<[1], [0], [0], [1], [0, 0, 1, 1], [], []>} : vector<64x4xbf16>, vector<4x256xbf16>, vector<64x256xf32> -> vector<64x256xf32>
    %29 = arith.addf %23, %28 : vector<64x256xf32>
    %30 = vector.extract_strided_slice %1 {offsets = [27, 0, 0], sizes = [8, 8, 4], strides = [1, 1, 1]} : vector<36x9x4xbf16> to vector<8x8x4xbf16>
    %31 = vector.shape_cast %30 : vector<8x8x4xbf16> to vector<64x4xbf16>
    %c4 = arith.constant 4 : index
    %c0_18 = arith.constant 0 : index
    %c0_19 = arith.constant 0 : index
    %32 = vector.load %arg3[%c4, %c0_18, %c0_19] : memref<9x4x256xbf16, #tpu.memory_space<vmem>>, vector<1x4x256xbf16>
    %33 = vector.shape_cast %32 : vector<1x4x256xbf16> to vector<4x256xbf16>
    %cst_20 = arith.constant dense<0.000000e+00> : vector<64x256xf32>
    %34 = tpu.matmul %31, %33, %cst_20 {dimension_numbers = #tpu.dot_dimension_numbers<[1], [0], [0], [1], [0, 0, 1, 1], [], []>} : vector<64x4xbf16>, vector<4x256xbf16>, vector<64x256xf32> -> vector<64x256xf32>
    %35 = arith.addf %29, %34 : vector<64x256xf32>
    %36 = vector.extract_strided_slice %1 {offsets = [18, 1, 0], sizes = [8, 8, 4], strides = [1, 1, 1]} : vector<36x9x4xbf16> to vector<8x8x4xbf16>
    %37 = vector.shape_cast %36 : vector<8x8x4xbf16> to vector<64x4xbf16>
    %c5 = arith.constant 5 : index
    %c0_21 = arith.constant 0 : index
    %c0_22 = arith.constant 0 : index
    %38 = vector.load %arg3[%c5, %c0_21, %c0_22] : memref<9x4x256xbf16, #tpu.memory_space<vmem>>, vector<1x4x256xbf16>
    %39 = vector.shape_cast %38 : vector<1x4x256xbf16> to vector<4x256xbf16>
    %cst_23 = arith.constant dense<0.000000e+00> : vector<64x256xf32>
    %40 = tpu.matmul %37, %39, %cst_23 {dimension_numbers = #tpu.dot_dimension_numbers<[1], [0], [0], [1], [0, 0, 1, 1], [], []>} : vector<64x4xbf16>, vector<4x256xbf16>, vector<64x256xf32> -> vector<64x256xf32>
    %41 = arith.addf %35, %40 : vector<64x256xf32>
    %42 = vector.extract_strided_slice %1 {offsets = [1, 0, 0], sizes = [8, 8, 4], strides = [1, 1, 1]} : vector<36x9x4xbf16> to vector<8x8x4xbf16>
    %43 = vector.shape_cast %42 : vector<8x8x4xbf16> to vector<64x4xbf16>
    %c6 = arith.constant 6 : index
    %c0_24 = arith.constant 0 : index
    %c0_25 = arith.constant 0 : index
    %44 = vector.load %arg3[%c6, %c0_24, %c0_25] : memref<9x4x256xbf16, #tpu.memory_space<vmem>>, vector<1x4x256xbf16>
    %45 = vector.shape_cast %44 : vector<1x4x256xbf16> to vector<4x256xbf16>
    %cst_26 = arith.constant dense<0.000000e+00> : vector<64x256xf32>
    %46 = tpu.matmul %43, %45, %cst_26 {dimension_numbers = #tpu.dot_dimension_numbers<[1], [0], [0], [1], [0, 0, 1, 1], [], []>} : vector<64x4xbf16>, vector<4x256xbf16>, vector<64x256xf32> -> vector<64x256xf32>
    %47 = arith.addf %41, %46 : vector<64x256xf32>
    %48 = vector.extract_strided_slice %1 {offsets = [10, 0, 0], sizes = [8, 8, 4], strides = [1, 1, 1]} : vector<36x9x4xbf16> to vector<8x8x4xbf16>
    %49 = vector.shape_cast %48 : vector<8x8x4xbf16> to vector<64x4xbf16>
    %c7 = arith.constant 7 : index
    %c0_27 = arith.constant 0 : index
    %c0_28 = arith.constant 0 : index
    %50 = vector.load %arg3[%c7, %c0_27, %c0_28] : memref<9x4x256xbf16, #tpu.memory_space<vmem>>, vector<1x4x256xbf16>
    %51 = vector.shape_cast %50 : vector<1x4x256xbf16> to vector<4x256xbf16>
    %cst_29 = arith.constant dense<0.000000e+00> : vector<64x256xf32>
    %52 = tpu.matmul %49, %51, %cst_29 {dimension_numbers = #tpu.dot_dimension_numbers<[1], [0], [0], [1], [0, 0, 1, 1], [], []>} : vector<64x4xbf16>, vector<4x256xbf16>, vector<64x256xf32> -> vector<64x256xf32>
    %53 = arith.addf %47, %52 : vector<64x256xf32>
    %54 = vector.extract_strided_slice %1 {offsets = [1, 1, 0], sizes = [8, 8, 4], strides = [1, 1, 1]} : vector<36x9x4xbf16> to vector<8x8x4xbf16>
    %55 = vector.shape_cast %54 : vector<8x8x4xbf16> to vector<64x4xbf16>
    %c8 = arith.constant 8 : index
    %c0_30 = arith.constant 0 : index
    %c0_31 = arith.constant 0 : index
    %56 = vector.load %arg3[%c8, %c0_30, %c0_31] : memref<9x4x256xbf16, #tpu.memory_space<vmem>>, vector<1x4x256xbf16>
    %57 = vector.shape_cast %56 : vector<1x4x256xbf16> to vector<4x256xbf16>
    %cst_32 = arith.constant dense<0.000000e+00> : vector<64x256xf32>
    %58 = tpu.matmul %55, %57, %cst_32 {dimension_numbers = #tpu.dot_dimension_numbers<[1], [0], [0], [1], [0, 0, 1, 1], [], []>} : vector<64x4xbf16>, vector<4x256xbf16>, vector<64x256xf32> -> vector<64x256xf32>
    %59 = arith.addf %53, %58 : vector<64x256xf32>
    %60 = vector.shape_cast %59 : vector<64x256xf32> to vector<8x8x256xf32>
    %61 = arith.truncf %60 : vector<8x8x256xf32> to vector<8x8x256xbf16>
    %c0_33 = arith.constant 0 : index
    %c0_34 = arith.constant 0 : index
    %c0_35 = arith.constant 0 : index
    %c0_36 = arith.constant 0 : index
    %62 = vector.load %arg5[%c0_33, %c0_34, %c0_35, %c0_36] : memref<1x8x8x256xbf16, #tpu.memory_space<vmem>>, vector<1x8x8x256xbf16>
    %63 = vector.shape_cast %62 : vector<1x8x8x256xbf16> to vector<8x8x256xbf16>
    %64 = vector.shape_cast %61 : vector<8x8x256xbf16> to vector<1x8x8x256xbf16>
    tpu.vector_store %arg5[%c0_33, %c0_34, %c0_35, %c0_36], %64 {strides = array<i32>} : memref<1x8x8x256xbf16, #tpu.memory_space<vmem>>, vector<1x8x8x256xbf16>,
    %cst_37 = arith.constant dense<0.000000e+00> : vector<256xf32>
    %65 = vector.multi_reduction <add>, %59, %cst_37 [0] : vector<64x256xf32> to vector<256xf32>
    %66 = vector.shape_cast %65 : vector<256xf32> to vector<1x256xf32>
    %67 = arith.mulf %59, %59 : vector<64x256xf32>
    %cst_38 = arith.constant dense<0.000000e+00> : vector<256xf32>
    %68 = vector.multi_reduction <add>, %67, %cst_38 [0] : vector<64x256xf32> to vector<256xf32>
    %69 = vector.shape_cast %68 : vector<256xf32> to vector<1x256xf32>
    %70 = tpu.concatenate %66, %69 in 0 : vector<1x256xf32>, vector<1x256xf32> -> vector<2x256xf32>
    %c0_39 = arith.constant 0 : index
    %c0_40 = arith.constant 0 : index
    %c0_41 = arith.constant 0 : index
    %71 = vector.load %arg6[%c0_39, %c0_40, %c0_41] : memref<1x2x256xf32, #tpu.memory_space<vmem>>, vector<1x2x256xf32>
    %72 = vector.shape_cast %71 : vector<1x2x256xf32> to vector<2x256xf32>
    %73 = vector.shape_cast %70 : vector<2x256xf32> to vector<1x2x256xf32>
    tpu.vector_store %arg6[%c0_39, %c0_40, %c0_41], %73 {strides = array<i32>} : memref<1x2x256xf32, #tpu.memory_space<vmem>>, vector<1x2x256xf32>,
    return
  }
  func.func @transform_0(%arg0: i32, %arg1: i32) -> (i32, i32, i32, i32) {
    %c1_i32 = arith.constant 1 : i32
    %0 = arith.muli %arg0, %c1_i32 : i32
    %1 = arith.addi %0, %arg1 : i32
    %c0_i32 = arith.constant 0 : i32
    %c0_i32_0 = arith.constant 0 : i32
    %c0_i32_1 = arith.constant 0 : i32
    %c0_i32_2 = arith.constant 0 : i32
    return %1, %c0_i32, %c0_i32_0, %c0_i32_1 : i32, i32, i32, i32
  }
  func.func @transform_1(%arg0: i32, %arg1: i32) -> (i32, i32, i32) {
    %c0_i32 = arith.constant 0 : i32
    %c0_i32_0 = arith.constant 0 : i32
    %c0_i32_1 = arith.constant 0 : i32
    %c0_i32_2 = arith.constant 0 : i32
    return %c0_i32, %c0_i32_0, %c0_i32_1 : i32, i32, i32
  }
  func.func @transform_2(%arg0: i32, %arg1: i32) -> (i32, i32) {
    %c0_i32 = arith.constant 0 : i32
    %c0_i32_0 = arith.constant 0 : i32
    %c0_i32_1 = arith.constant 0 : i32
    return %c0_i32, %c0_i32_0 : i32, i32
  }
  func.func @transform_3(%arg0: i32, %arg1: i32) -> (i32, i32, i32, i32) {
    %c0_i32 = arith.constant 0 : i32
    %c0_i32_0 = arith.constant 0 : i32
    %c0_i32_1 = arith.constant 0 : i32
    return %arg0, %arg1, %c0_i32, %c0_i32_0 : i32, i32, i32, i32
  }
  func.func @transform_4(%arg0: i32, %arg1: i32) -> (i32, i32, i32) {
    %c1_i32 = arith.constant 1 : i32
    %0 = arith.muli %arg0, %c1_i32 : i32
    %1 = arith.addi %0, %arg1 : i32
    %c0_i32 = arith.constant 0 : i32
    %c0_i32_0 = arith.constant 0 : i32
    %c0_i32_1 = arith.constant 0 : i32
    return %1, %c0_i32, %c0_i32_0 : i32, i32, i32
  }
}

module attributes {stable_mosaic.version = 11 : i64} {
  func.func @_bn_relu_conv_bnstats_kernel(%arg0: i32, %arg1: memref<1x8x8x128xbf16, #tpu.memory_space<vmem>>, %arg2: memref<1x128xf32, #tpu.memory_space<vmem>>, %arg3: memref<1x128xf32, #tpu.memory_space<vmem>>, %arg4: memref<9x128x128xbf16, #tpu.memory_space<vmem>>, %arg5: memref<1x128xf32, #tpu.memory_space<vmem>>, %arg6: memref<1x8x8x128xbf16, #tpu.memory_space<vmem>>, %arg7: memref<1x2x128xf32, #tpu.memory_space<vmem>>) attributes {dimension_semantics = [#tpu.dimension_semantics<parallel>], iteration_bounds = array<i64: 2>, scalar_prefetch = 0 : i64, scratch_operands = 0 : i64, tpu.core_type = #tpu.core_type<tc>, window_params = [{transform_indices = @transform_0, window_bounds = array<i64: 1, 8, 8, 128>}, {pipeline_mode = #tpu.pipeline_mode<synchronous>, transform_indices = @transform_1, window_bounds = array<i64: 1, 128>}, {pipeline_mode = #tpu.pipeline_mode<synchronous>, transform_indices = @transform_2, window_bounds = array<i64: 1, 128>}, {pipeline_mode = #tpu.pipeline_mode<synchronous>, transform_indices = @transform_3, window_bounds = array<i64: 9, 128, 128>}, {pipeline_mode = #tpu.pipeline_mode<synchronous>, transform_indices = @transform_4, window_bounds = array<i64: 1, 128>}, {transform_indices = @transform_5, window_bounds = array<i64: 1, 8, 8, 128>}, {transform_indices = @transform_6, window_bounds = array<i64: 1, 2, 128>}]} {
    %c0 = arith.constant 0 : index
    %c0_0 = arith.constant 0 : index
    %c0_1 = arith.constant 0 : index
    %c0_2 = arith.constant 0 : index
    %0 = vector.load %arg1[%c0, %c0_0, %c0_1, %c0_2] : memref<1x8x8x128xbf16, #tpu.memory_space<vmem>>, vector<1x8x8x128xbf16>
    %1 = vector.shape_cast %0 : vector<1x8x8x128xbf16> to vector<8x8x128xbf16>
    %2 = arith.extf %1 : vector<8x8x128xbf16> to vector<8x8x128xf32>
    %c0_3 = arith.constant 0 : index
    %c0_4 = arith.constant 0 : index
    %3 = vector.load %arg2[%c0_3, %c0_4] : memref<1x128xf32, #tpu.memory_space<vmem>>, vector<1x128xf32>
    %4 = vector.shape_cast %3 : vector<1x128xf32> to vector<1x1x128xf32>
    %5 = vector.broadcast %4 : vector<1x1x128xf32> to vector<8x8x128xf32>
    %6 = arith.mulf %2, %5 : vector<8x8x128xf32>
    %c0_5 = arith.constant 0 : index
    %c0_6 = arith.constant 0 : index
    %7 = vector.load %arg3[%c0_5, %c0_6] : memref<1x128xf32, #tpu.memory_space<vmem>>, vector<1x128xf32>
    %8 = vector.shape_cast %7 : vector<1x128xf32> to vector<1x1x128xf32>
    %9 = vector.broadcast %8 : vector<1x1x128xf32> to vector<8x8x128xf32>
    %10 = arith.addf %6, %9 : vector<8x8x128xf32>
    %cst = arith.constant 0.000000e+00 : f32
    %11 = vector.broadcast %cst : f32 to vector<8x8x128xf32>
    %12 = arith.maximumf %10, %11 : vector<8x8x128xf32>
    %13 = arith.truncf %12 : vector<8x8x128xf32> to vector<8x8x128xbf16>
    %cst_7 = arith.constant 0.000000e+00 : bf16
    %14 = vector.broadcast %cst_7 : bf16 to vector<8x1x128xbf16>
    %15 = tpu.concatenate %14, %13, %14 in 1 : vector<8x1x128xbf16>, vector<8x8x128xbf16>, vector<8x1x128xbf16> -> vector<8x10x128xbf16>
    %cst_8 = arith.constant 0.000000e+00 : bf16
    %16 = vector.broadcast %cst_8 : bf16 to vector<1x10x128xbf16>
    %17 = tpu.concatenate %16, %15, %16 in 0 : vector<1x10x128xbf16>, vector<8x10x128xbf16>, vector<1x10x128xbf16> -> vector<10x10x128xbf16>
    %cst_9 = arith.constant 0.000000e+00 : f32
    %18 = vector.broadcast %cst_9 : f32 to vector<64x128xf32>
    %c0_10 = arith.constant 0 : index
    %c0_11 = arith.constant 0 : index
    %19 = vector.load %arg5[%c0_10, %c0_11] : memref<1x128xf32, #tpu.memory_space<vmem>>, vector<1x128xf32>
    %20 = vector.broadcast %19 : vector<1x128xf32> to vector<64x128xf32>
    %21 = arith.addf %18, %20 : vector<64x128xf32>
    %22 = vector.extract_strided_slice %17 {offsets = [0, 0, 0], sizes = [8, 8, 128], strides = [1, 1, 1]} : vector<10x10x128xbf16> to vector<8x8x128xbf16>
    %23 = vector.shape_cast %22 : vector<8x8x128xbf16> to vector<64x128xbf16>
    %c0_12 = arith.constant 0 : index
    %c0_13 = arith.constant 0 : index
    %c0_14 = arith.constant 0 : index
    %24 = vector.load %arg4[%c0_12, %c0_13, %c0_14] : memref<9x128x128xbf16, #tpu.memory_space<vmem>>, vector<1x128x128xbf16>
    %25 = vector.shape_cast %24 : vector<1x128x128xbf16> to vector<128x128xbf16>
    %cst_15 = arith.constant dense<0.000000e+00> : vector<64x128xf32>
    %26 = tpu.matmul %23, %25, %cst_15 {dimension_numbers = #tpu.dot_dimension_numbers<[1], [0], [0], [1], [0, 0, 1, 1], [], []>} : vector<64x128xbf16>, vector<128x128xbf16>, vector<64x128xf32> -> vector<64x128xf32>
    %27 = arith.addf %21, %26 : vector<64x128xf32>
    %28 = vector.extract_strided_slice %17 {offsets = [0, 1, 0], sizes = [8, 8, 128], strides = [1, 1, 1]} : vector<10x10x128xbf16> to vector<8x8x128xbf16>
    %29 = vector.shape_cast %28 : vector<8x8x128xbf16> to vector<64x128xbf16>
    %c1 = arith.constant 1 : index
    %c0_16 = arith.constant 0 : index
    %c0_17 = arith.constant 0 : index
    %30 = vector.load %arg4[%c1, %c0_16, %c0_17] : memref<9x128x128xbf16, #tpu.memory_space<vmem>>, vector<1x128x128xbf16>
    %31 = vector.shape_cast %30 : vector<1x128x128xbf16> to vector<128x128xbf16>
    %cst_18 = arith.constant dense<0.000000e+00> : vector<64x128xf32>
    %32 = tpu.matmul %29, %31, %cst_18 {dimension_numbers = #tpu.dot_dimension_numbers<[1], [0], [0], [1], [0, 0, 1, 1], [], []>} : vector<64x128xbf16>, vector<128x128xbf16>, vector<64x128xf32> -> vector<64x128xf32>
    %33 = arith.addf %27, %32 : vector<64x128xf32>
    %34 = vector.extract_strided_slice %17 {offsets = [0, 2, 0], sizes = [8, 8, 128], strides = [1, 1, 1]} : vector<10x10x128xbf16> to vector<8x8x128xbf16>
    %35 = vector.shape_cast %34 : vector<8x8x128xbf16> to vector<64x128xbf16>
    %c2 = arith.constant 2 : index
    %c0_19 = arith.constant 0 : index
    %c0_20 = arith.constant 0 : index
    %36 = vector.load %arg4[%c2, %c0_19, %c0_20] : memref<9x128x128xbf16, #tpu.memory_space<vmem>>, vector<1x128x128xbf16>
    %37 = vector.shape_cast %36 : vector<1x128x128xbf16> to vector<128x128xbf16>
    %cst_21 = arith.constant dense<0.000000e+00> : vector<64x128xf32>
    %38 = tpu.matmul %35, %37, %cst_21 {dimension_numbers = #tpu.dot_dimension_numbers<[1], [0], [0], [1], [0, 0, 1, 1], [], []>} : vector<64x128xbf16>, vector<128x128xbf16>, vector<64x128xf32> -> vector<64x128xf32>
    %39 = arith.addf %33, %38 : vector<64x128xf32>
    %40 = vector.extract_strided_slice %17 {offsets = [1, 0, 0], sizes = [8, 8, 128], strides = [1, 1, 1]} : vector<10x10x128xbf16> to vector<8x8x128xbf16>
    %41 = vector.shape_cast %40 : vector<8x8x128xbf16> to vector<64x128xbf16>
    %c3 = arith.constant 3 : index
    %c0_22 = arith.constant 0 : index
    %c0_23 = arith.constant 0 : index
    %42 = vector.load %arg4[%c3, %c0_22, %c0_23] : memref<9x128x128xbf16, #tpu.memory_space<vmem>>, vector<1x128x128xbf16>
    %43 = vector.shape_cast %42 : vector<1x128x128xbf16> to vector<128x128xbf16>
    %cst_24 = arith.constant dense<0.000000e+00> : vector<64x128xf32>
    %44 = tpu.matmul %41, %43, %cst_24 {dimension_numbers = #tpu.dot_dimension_numbers<[1], [0], [0], [1], [0, 0, 1, 1], [], []>} : vector<64x128xbf16>, vector<128x128xbf16>, vector<64x128xf32> -> vector<64x128xf32>
    %45 = arith.addf %39, %44 : vector<64x128xf32>
    %46 = vector.extract_strided_slice %17 {offsets = [1, 1, 0], sizes = [8, 8, 128], strides = [1, 1, 1]} : vector<10x10x128xbf16> to vector<8x8x128xbf16>
    %47 = vector.shape_cast %46 : vector<8x8x128xbf16> to vector<64x128xbf16>
    %c4 = arith.constant 4 : index
    %c0_25 = arith.constant 0 : index
    %c0_26 = arith.constant 0 : index
    %48 = vector.load %arg4[%c4, %c0_25, %c0_26] : memref<9x128x128xbf16, #tpu.memory_space<vmem>>, vector<1x128x128xbf16>
    %49 = vector.shape_cast %48 : vector<1x128x128xbf16> to vector<128x128xbf16>
    %cst_27 = arith.constant dense<0.000000e+00> : vector<64x128xf32>
    %50 = tpu.matmul %47, %49, %cst_27 {dimension_numbers = #tpu.dot_dimension_numbers<[1], [0], [0], [1], [0, 0, 1, 1], [], []>} : vector<64x128xbf16>, vector<128x128xbf16>, vector<64x128xf32> -> vector<64x128xf32>
    %51 = arith.addf %45, %50 : vector<64x128xf32>
    %52 = vector.extract_strided_slice %17 {offsets = [1, 2, 0], sizes = [8, 8, 128], strides = [1, 1, 1]} : vector<10x10x128xbf16> to vector<8x8x128xbf16>
    %53 = vector.shape_cast %52 : vector<8x8x128xbf16> to vector<64x128xbf16>
    %c5 = arith.constant 5 : index
    %c0_28 = arith.constant 0 : index
    %c0_29 = arith.constant 0 : index
    %54 = vector.load %arg4[%c5, %c0_28, %c0_29] : memref<9x128x128xbf16, #tpu.memory_space<vmem>>, vector<1x128x128xbf16>
    %55 = vector.shape_cast %54 : vector<1x128x128xbf16> to vector<128x128xbf16>
    %cst_30 = arith.constant dense<0.000000e+00> : vector<64x128xf32>
    %56 = tpu.matmul %53, %55, %cst_30 {dimension_numbers = #tpu.dot_dimension_numbers<[1], [0], [0], [1], [0, 0, 1, 1], [], []>} : vector<64x128xbf16>, vector<128x128xbf16>, vector<64x128xf32> -> vector<64x128xf32>
    %57 = arith.addf %51, %56 : vector<64x128xf32>
    %58 = vector.extract_strided_slice %17 {offsets = [2, 0, 0], sizes = [8, 8, 128], strides = [1, 1, 1]} : vector<10x10x128xbf16> to vector<8x8x128xbf16>
    %59 = vector.shape_cast %58 : vector<8x8x128xbf16> to vector<64x128xbf16>
    %c6 = arith.constant 6 : index
    %c0_31 = arith.constant 0 : index
    %c0_32 = arith.constant 0 : index
    %60 = vector.load %arg4[%c6, %c0_31, %c0_32] : memref<9x128x128xbf16, #tpu.memory_space<vmem>>, vector<1x128x128xbf16>
    %61 = vector.shape_cast %60 : vector<1x128x128xbf16> to vector<128x128xbf16>
    %cst_33 = arith.constant dense<0.000000e+00> : vector<64x128xf32>
    %62 = tpu.matmul %59, %61, %cst_33 {dimension_numbers = #tpu.dot_dimension_numbers<[1], [0], [0], [1], [0, 0, 1, 1], [], []>} : vector<64x128xbf16>, vector<128x128xbf16>, vector<64x128xf32> -> vector<64x128xf32>
    %63 = arith.addf %57, %62 : vector<64x128xf32>
    %64 = vector.extract_strided_slice %17 {offsets = [2, 1, 0], sizes = [8, 8, 128], strides = [1, 1, 1]} : vector<10x10x128xbf16> to vector<8x8x128xbf16>
    %65 = vector.shape_cast %64 : vector<8x8x128xbf16> to vector<64x128xbf16>
    %c7 = arith.constant 7 : index
    %c0_34 = arith.constant 0 : index
    %c0_35 = arith.constant 0 : index
    %66 = vector.load %arg4[%c7, %c0_34, %c0_35] : memref<9x128x128xbf16, #tpu.memory_space<vmem>>, vector<1x128x128xbf16>
    %67 = vector.shape_cast %66 : vector<1x128x128xbf16> to vector<128x128xbf16>
    %cst_36 = arith.constant dense<0.000000e+00> : vector<64x128xf32>
    %68 = tpu.matmul %65, %67, %cst_36 {dimension_numbers = #tpu.dot_dimension_numbers<[1], [0], [0], [1], [0, 0, 1, 1], [], []>} : vector<64x128xbf16>, vector<128x128xbf16>, vector<64x128xf32> -> vector<64x128xf32>
    %69 = arith.addf %63, %68 : vector<64x128xf32>
    %70 = vector.extract_strided_slice %17 {offsets = [2, 2, 0], sizes = [8, 8, 128], strides = [1, 1, 1]} : vector<10x10x128xbf16> to vector<8x8x128xbf16>
    %71 = vector.shape_cast %70 : vector<8x8x128xbf16> to vector<64x128xbf16>
    %c8 = arith.constant 8 : index
    %c0_37 = arith.constant 0 : index
    %c0_38 = arith.constant 0 : index
    %72 = vector.load %arg4[%c8, %c0_37, %c0_38] : memref<9x128x128xbf16, #tpu.memory_space<vmem>>, vector<1x128x128xbf16>
    %73 = vector.shape_cast %72 : vector<1x128x128xbf16> to vector<128x128xbf16>
    %cst_39 = arith.constant dense<0.000000e+00> : vector<64x128xf32>
    %74 = tpu.matmul %71, %73, %cst_39 {dimension_numbers = #tpu.dot_dimension_numbers<[1], [0], [0], [1], [0, 0, 1, 1], [], []>} : vector<64x128xbf16>, vector<128x128xbf16>, vector<64x128xf32> -> vector<64x128xf32>
    %75 = arith.addf %69, %74 : vector<64x128xf32>
    %76 = vector.shape_cast %75 : vector<64x128xf32> to vector<8x8x128xf32>
    %77 = arith.truncf %76 : vector<8x8x128xf32> to vector<8x8x128xbf16>
    %c0_40 = arith.constant 0 : index
    %c0_41 = arith.constant 0 : index
    %c0_42 = arith.constant 0 : index
    %c0_43 = arith.constant 0 : index
    %78 = vector.load %arg6[%c0_40, %c0_41, %c0_42, %c0_43] : memref<1x8x8x128xbf16, #tpu.memory_space<vmem>>, vector<1x8x8x128xbf16>
    %79 = vector.shape_cast %78 : vector<1x8x8x128xbf16> to vector<8x8x128xbf16>
    %80 = vector.shape_cast %77 : vector<8x8x128xbf16> to vector<1x8x8x128xbf16>
    tpu.vector_store %arg6[%c0_40, %c0_41, %c0_42, %c0_43], %80 {strides = array<i32>} : memref<1x8x8x128xbf16, #tpu.memory_space<vmem>>, vector<1x8x8x128xbf16>,
    %cst_44 = arith.constant dense<0.000000e+00> : vector<128xf32>
    %81 = vector.multi_reduction <add>, %75, %cst_44 [0] : vector<64x128xf32> to vector<128xf32>
    %82 = vector.shape_cast %81 : vector<128xf32> to vector<1x128xf32>
    %83 = arith.mulf %75, %75 : vector<64x128xf32>
    %cst_45 = arith.constant dense<0.000000e+00> : vector<128xf32>
    %84 = vector.multi_reduction <add>, %83, %cst_45 [0] : vector<64x128xf32> to vector<128xf32>
    %85 = vector.shape_cast %84 : vector<128xf32> to vector<1x128xf32>
    %86 = tpu.concatenate %82, %85 in 0 : vector<1x128xf32>, vector<1x128xf32> -> vector<2x128xf32>
    %c0_46 = arith.constant 0 : index
    %c0_47 = arith.constant 0 : index
    %c0_48 = arith.constant 0 : index
    %87 = vector.load %arg7[%c0_46, %c0_47, %c0_48] : memref<1x2x128xf32, #tpu.memory_space<vmem>>, vector<1x2x128xf32>
    %88 = vector.shape_cast %87 : vector<1x2x128xf32> to vector<2x128xf32>
    %89 = vector.shape_cast %86 : vector<2x128xf32> to vector<1x2x128xf32>
    tpu.vector_store %arg7[%c0_46, %c0_47, %c0_48], %89 {strides = array<i32>} : memref<1x2x128xf32, #tpu.memory_space<vmem>>, vector<1x2x128xf32>,
    return
  }
  func.func @transform_0(%arg0: i32) -> (i32, i32, i32, i32) {
    %c0_i32 = arith.constant 0 : i32
    %c0_i32_0 = arith.constant 0 : i32
    %c0_i32_1 = arith.constant 0 : i32
    %c0_i32_2 = arith.constant 0 : i32
    return %arg0, %c0_i32, %c0_i32_0, %c0_i32_1 : i32, i32, i32, i32
  }
  func.func @transform_1(%arg0: i32) -> (i32, i32) {
    %c0_i32 = arith.constant 0 : i32
    %c0_i32_0 = arith.constant 0 : i32
    %c0_i32_1 = arith.constant 0 : i32
    return %c0_i32, %c0_i32_0 : i32, i32
  }
  func.func @transform_2(%arg0: i32) -> (i32, i32) {
    %c0_i32 = arith.constant 0 : i32
    %c0_i32_0 = arith.constant 0 : i32
    %c0_i32_1 = arith.constant 0 : i32
    return %c0_i32, %c0_i32_0 : i32, i32
  }
  func.func @transform_3(%arg0: i32) -> (i32, i32, i32) {
    %c0_i32 = arith.constant 0 : i32
    %c0_i32_0 = arith.constant 0 : i32
    %c0_i32_1 = arith.constant 0 : i32
    %c0_i32_2 = arith.constant 0 : i32
    return %c0_i32, %c0_i32_0, %c0_i32_1 : i32, i32, i32
  }
  func.func @transform_4(%arg0: i32) -> (i32, i32) {
    %c0_i32 = arith.constant 0 : i32
    %c0_i32_0 = arith.constant 0 : i32
    %c0_i32_1 = arith.constant 0 : i32
    return %c0_i32, %c0_i32_0 : i32, i32
  }
  func.func @transform_5(%arg0: i32) -> (i32, i32, i32, i32) {
    %c0_i32 = arith.constant 0 : i32
    %c0_i32_0 = arith.constant 0 : i32
    %c0_i32_1 = arith.constant 0 : i32
    %c0_i32_2 = arith.constant 0 : i32
    return %arg0, %c0_i32, %c0_i32_0, %c0_i32_1 : i32, i32, i32, i32
  }
  func.func @transform_6(%arg0: i32) -> (i32, i32, i32) {
    %c0_i32 = arith.constant 0 : i32
    %c0_i32_0 = arith.constant 0 : i32
    %c0_i32_1 = arith.constant 0 : i32
    return %arg0, %c0_i32, %c0_i32_0 : i32, i32, i32
  }
}

module attributes {stable_mosaic.version = 11 : i64} {
  func.func @_bn_add_relu_kernel(%arg0: i32, %arg1: memref<2x8x8x128xbf16, #tpu.memory_space<vmem>>, %arg2: memref<2x8x8x128xbf16, #tpu.memory_space<vmem>>, %arg3: memref<1x128xf32, #tpu.memory_space<vmem>>, %arg4: memref<1x128xf32, #tpu.memory_space<vmem>>, %arg5: memref<1x128xf32, #tpu.memory_space<vmem>>, %arg6: memref<1x128xf32, #tpu.memory_space<vmem>>, %arg7: memref<2x8x8x128xf32, #tpu.memory_space<vmem>>) attributes {dimension_semantics = [#tpu.dimension_semantics<parallel>], iteration_bounds = array<i64: 1>, scalar_prefetch = 0 : i64, scratch_operands = 0 : i64, tpu.core_type = #tpu.core_type<tc>, window_params = [{transform_indices = @transform_0, window_bounds = array<i64: 2, 8, 8, 128>}, {transform_indices = @transform_1, window_bounds = array<i64: 2, 8, 8, 128>}, {pipeline_mode = #tpu.pipeline_mode<synchronous>, transform_indices = @transform_2, window_bounds = array<i64: 1, 128>}, {pipeline_mode = #tpu.pipeline_mode<synchronous>, transform_indices = @transform_3, window_bounds = array<i64: 1, 128>}, {pipeline_mode = #tpu.pipeline_mode<synchronous>, transform_indices = @transform_4, window_bounds = array<i64: 1, 128>}, {pipeline_mode = #tpu.pipeline_mode<synchronous>, transform_indices = @transform_5, window_bounds = array<i64: 1, 128>}, {transform_indices = @transform_6, window_bounds = array<i64: 2, 8, 8, 128>}]} {
    %c0 = arith.constant 0 : index
    %c0_0 = arith.constant 0 : index
    %0 = vector.load %arg3[%c0, %c0_0] : memref<1x128xf32, #tpu.memory_space<vmem>>, vector<1x128xf32>
    %1 = vector.shape_cast %0 : vector<1x128xf32> to vector<1x1x1x128xf32>
    %c0_1 = arith.constant 0 : index
    %c0_2 = arith.constant 0 : index
    %2 = vector.load %arg4[%c0_1, %c0_2] : memref<1x128xf32, #tpu.memory_space<vmem>>, vector<1x128xf32>
    %3 = vector.shape_cast %2 : vector<1x128xf32> to vector<1x1x1x128xf32>
    %c0_3 = arith.constant 0 : index
    %c0_4 = arith.constant 0 : index
    %4 = vector.load %arg5[%c0_3, %c0_4] : memref<1x128xf32, #tpu.memory_space<vmem>>, vector<1x128xf32>
    %5 = vector.shape_cast %4 : vector<1x128xf32> to vector<1x1x1x128xf32>
    %c0_5 = arith.constant 0 : index
    %c0_6 = arith.constant 0 : index
    %6 = vector.load %arg6[%c0_5, %c0_6] : memref<1x128xf32, #tpu.memory_space<vmem>>, vector<1x128xf32>
    %7 = vector.shape_cast %6 : vector<1x128xf32> to vector<1x1x1x128xf32>
    %c0_7 = arith.constant 0 : index
    %c0_8 = arith.constant 0 : index
    %c0_9 = arith.constant 0 : index
    %c0_10 = arith.constant 0 : index
    %8 = vector.load %arg1[%c0_7, %c0_8, %c0_9, %c0_10] : memref<2x8x8x128xbf16, #tpu.memory_space<vmem>>, vector<2x8x8x128xbf16>
    %9 = arith.extf %8 : vector<2x8x8x128xbf16> to vector<2x8x8x128xf32>
    %c0_11 = arith.constant 0 : index
    %c0_12 = arith.constant 0 : index
    %c0_13 = arith.constant 0 : index
    %c0_14 = arith.constant 0 : index
    %10 = vector.load %arg2[%c0_11, %c0_12, %c0_13, %c0_14] : memref<2x8x8x128xbf16, #tpu.memory_space<vmem>>, vector<2x8x8x128xbf16>
    %11 = arith.extf %10 : vector<2x8x8x128xbf16> to vector<2x8x8x128xf32>
    %12 = vector.broadcast %1 : vector<1x1x1x128xf32> to vector<2x8x8x128xf32>
    %13 = arith.mulf %9, %12 : vector<2x8x8x128xf32>
    %14 = vector.broadcast %3 : vector<1x1x1x128xf32> to vector<2x8x8x128xf32>
    %15 = arith.addf %13, %14 : vector<2x8x8x128xf32>
    %16 = vector.broadcast %5 : vector<1x1x1x128xf32> to vector<2x8x8x128xf32>
    %17 = arith.mulf %11, %16 : vector<2x8x8x128xf32>
    %18 = arith.addf %15, %17 : vector<2x8x8x128xf32>
    %19 = vector.broadcast %7 : vector<1x1x1x128xf32> to vector<2x8x8x128xf32>
    %20 = arith.addf %18, %19 : vector<2x8x8x128xf32>
    %cst = arith.constant 0.000000e+00 : f32
    %21 = vector.broadcast %cst : f32 to vector<2x8x8x128xf32>
    %22 = arith.maximumf %20, %21 : vector<2x8x8x128xf32>
    %c0_15 = arith.constant 0 : index
    %c0_16 = arith.constant 0 : index
    %c0_17 = arith.constant 0 : index
    %c0_18 = arith.constant 0 : index
    %23 = vector.load %arg7[%c0_15, %c0_16, %c0_17, %c0_18] : memref<2x8x8x128xf32, #tpu.memory_space<vmem>>, vector<2x8x8x128xf32>
    tpu.vector_store %arg7[%c0_15, %c0_16, %c0_17, %c0_18], %22 {strides = array<i32>} : memref<2x8x8x128xf32, #tpu.memory_space<vmem>>, vector<2x8x8x128xf32>,
    return
  }
  func.func @transform_0(%arg0: i32) -> (i32, i32, i32, i32) {
    %c0_i32 = arith.constant 0 : i32
    %c0_i32_0 = arith.constant 0 : i32
    %c0_i32_1 = arith.constant 0 : i32
    %c0_i32_2 = arith.constant 0 : i32
    return %arg0, %c0_i32, %c0_i32_0, %c0_i32_1 : i32, i32, i32, i32
  }
  func.func @transform_1(%arg0: i32) -> (i32, i32, i32, i32) {
    %c0_i32 = arith.constant 0 : i32
    %c0_i32_0 = arith.constant 0 : i32
    %c1_i32 = arith.constant 1 : i32
    %c0_i32_1 = arith.constant 0 : i32
    return %arg0, %c0_i32, %c0_i32_0, %c1_i32 : i32, i32, i32, i32
  }
  func.func @transform_2(%arg0: i32) -> (i32, i32) {
    %c0_i32 = arith.constant 0 : i32
    %c0_i32_0 = arith.constant 0 : i32
    %c0_i32_1 = arith.constant 0 : i32
    return %c0_i32, %c0_i32_0 : i32, i32
  }
  func.func @transform_3(%arg0: i32) -> (i32, i32) {
    %c0_i32 = arith.constant 0 : i32
    %c0_i32_0 = arith.constant 0 : i32
    %c0_i32_1 = arith.constant 0 : i32
    return %c0_i32, %c0_i32_0 : i32, i32
  }
  func.func @transform_4(%arg0: i32) -> (i32, i32) {
    %c0_i32 = arith.constant 0 : i32
    %c0_i32_0 = arith.constant 0 : i32
    %c0_i32_1 = arith.constant 0 : i32
    return %c0_i32, %c0_i32_0 : i32, i32
  }
  func.func @transform_5(%arg0: i32) -> (i32, i32) {
    %c0_i32 = arith.constant 0 : i32
    %c0_i32_0 = arith.constant 0 : i32
    %c0_i32_1 = arith.constant 0 : i32
    return %c0_i32, %c0_i32_0 : i32, i32
  }
  func.func @transform_6(%arg0: i32) -> (i32, i32, i32, i32) {
    %c0_i32 = arith.constant 0 : i32
    %c0_i32_0 = arith.constant 0 : i32
    %c0_i32_1 = arith.constant 0 : i32
    %c0_i32_2 = arith.constant 0 : i32
    return %arg0, %c0_i32, %c0_i32_0, %c0_i32_1 : i32, i32, i32, i32
  }
}

</mosaic_0001>

<bundles_post_ra>
// kernel: res2d_forward.3
= control target key start
LH: loop header
LB: loop body
LE: loop exit
PB: predicated region body
PF: predicated region fallthrough
CT: control target
= control target key end

     0   :  { %s2392_s15 = smov 0   ;;  %s2394_s16 = smov 0   ;;  %s2854_s0 = inlined_call_operand.vmem [shape: bf16[2,36,9,4], index: 0, kind: input, shape index: {}]   ;;  %s2855_s1 = inlined_call_operand.vmem [shape: bf16[9,4,256], index: 1, kind: input, shape index: {}]   ;;  %s2856_s2 = inlined_call_operand.vmem [shape: f32[1,256], index: 2, kind: input, shape index: {}]   ;;  %s2857_s3 = inlined_call_operand.vmem [shape: bf16[2,8,8,256], index: 3, kind: output, shape index: {0}]   ;;  %s2858_s4 = inlined_call_operand.vmem [shape: f32[2,2,256], index: 4, kind: output, shape index: {1}]  }
   0x1   :  { %s2396_s17 = smov 0  }
   0x2 LB: > { %s27_s18 = sadd.s32 1, %s2360_s16  ;;  %p2021_p0 = scmp.ge.s32.totalorder %s2364_s17, 1  ;;  %s2364_s17 = sphi %s2396_s17, %s15_s17   ;;  %s2360_s16 = sphi %s2394_s16, %s2862_s16   ;;  %s2356_s15 = sphi %s2392_s15, %s2861_s15  }
   0x3   : > { %p29_p1 = scmp.ge.s32.totalorder %s27_s18, 2  ;;  %p185_p2 = scmp.lt.s32.totalorder %s2364_s17, 3 }
   0x5   : > { %s2864_s18 = smov (%p29_p1, %s27_s18), 0  ;;  %p186_p3 = pnand %p2021_p0, %p185_p2 }
   0x6   : > { %v2031_v0 = vld.sshfl [vmem:[%s2855_s1] sm:$0x33 pattern:$0x76325410] (!%p186_p3)  ;;  %vm357_vm0 = vcmask (!%p186_p3), 1041408   ;;  %v2366_v4 = vmov (!%p186_p3), 0  }
   0x7   : > { %189 = sbr.rel (%p186_p3) target bundleno = 396 (0x18c), region = 32  ;;  %v343_v1 = vcombine.high (!%p186_p3), %v2031_v0, %v2031_v0  ;;  %v359_v2 = vsel (!%p186_p3), %vm357_vm0, %v2031_v0, 0  ;;  %v2075_v3 = vld.sshfl [vmem:[%s2855_s1 + $0x10] sm:$0x33 pattern:$0x76325410] (!%p186_p3)  ;;  %396 = vmatprep.mubr.bf16.mxu1 (!%p186_p3), %v2366_v4  ;;  %1055 = vmatprep.mubr.bf16.mxu0 (!%p186_p3), %v2366_v4 }
   0x8   : > { %p224_p4 = scmp.lt.s32.totalorder (!%p186_p3), %s2356_s15, 1  ;;  %v2419_v5 = vcombine.high (!%p186_p3), %v2075_v3, %v2075_v3  ;;  %v2422_v6 = vsel (!%p186_p3), %vm357_vm0, %v2075_v3, 0  ;;  %v2042_v7 = vld.sshfl [vmem:[%s2855_s1 + $0x4] sm:$0x33 pattern:$0x76325410] (!%p186_p3) }
   0x9   : > { %2032 = vmatprep.subr.msk.bf16.mxu1 (!%p186_p3), %vm357_vm0, %v343_v1  ;;  %v483_v8 = vcombine.high (!%p186_p3), %v2042_v7, %v2042_v7  ;;  %v2086_v9 = vld.sshfl [vmem:[%s2855_s1 + $0x14] sm:$0x33 pattern:$0x76325410] (!%p186_p3)  ;;  %vm344_vm1 = vcmask (!%p186_p3), 31744   ;;  %v497_v16 = vsel (!%p186_p3), %vm357_vm0, %v2042_v7, 0 }
   0xa   : > { %365 = vmatpush1.bf16.msra.mxu1 (!%p186_p3), %v359_v2  ;;  %2076 = vmatprep.subr.msk.bf16.mxu0 (!%p186_p3), %vm357_vm0, %v2419_v5  ;;  %v1246_v10 = vcombine.high (!%p186_p3), %v2086_v9, %v2086_v9  ;;  %v2097_v11 = vld.sshfl [vmem:[%s2855_s1 + $0x18] sm:$0x33 pattern:$0x76325410] (!%p186_p3)  ;;  %v1260_v18 = vsel (!%p186_p3), %vm357_vm0, %v2086_v9, 0  ;;  %vm1879_vm5 = vcmask (!%p186_p3), 1040384  }
   0xb   : > { %1024 = vmatpush1.bf16.msra.mxu0 (!%p186_p3), %v2422_v6  ;;  %2043 = vmatprep.subr.msk.bf16.mxu1 (!%p186_p3), %vm357_vm0, %v483_v8  ;;  %v2450_v12 = vld.sshfl [vmem:[%s2855_s1 + $0x8] sm:$0x33 pattern:$0x76325410] (!%p186_p3)  ;;  %v1370_v19 = vcombine.high (!%p186_p3), %v2097_v11, %v2097_v11  ;;  %vm591_vm2 = vsmask.f32 (!%p186_p3), 3328 }
   0xc   : > { %2087 = vmatprep.subr.msk.bf16.mxu0 (!%p186_p3), %vm357_vm0, %v1246_v10  ;;  %v728_v20 = vcombine.high (!%p186_p3), %v2450_v12, %v2450_v12  ;;  %vm592_vm3 = vsmask.f32 (!%p186_p3), 7440  ;;  %v1384_v42 = vsel (!%p186_p3), %vm357_vm0, %v2097_v11, 0 }
   0xd   : > { %v2513_v46 = vld.sshfl [vmem:[%s2855_s1 + $0x1c] sm:$0x33 pattern:$0x76325410] (!%p186_p3)  ;;  %vm2522_vm4 = vmor (!%p186_p3), %vm591_vm2, %vm592_vm3 }
   0xe   : > { %s2866_s15 = smov (!%p224_p4, %s2356_s15), 1  ;;  %v1494_v2 = vcombine.high %v2513_v46, %v2513_v46 }
   0xf   : > { %s2292_s27 = smul.u32 288, %s2866_s15  ;;  %s2136_s21 = sshll.u32 %s2866_s15, 6 }
  0x10   : > { %s2819_s24 = scalar_lea.vmem %s2857_s3, %s2136_s21  ;;  %s2137_s25 = sshll.u32 %s2866_s15, 2 }
  0x11   : > { %s2445_s6 = scalar_lea.vmem %s2854_s0, %s2292_s27  ;;  %s246_s28 = scalar_lea.vmem %s2858_s4, %s2137_s25 }
  0x12   : > { %v2453_v13 = vld [vmem:[%s2445_s6] sm:$0xf]  ;;  %v2456_v14 = vld [vmem:[%s2445_s6 + $0x8] sm:$0xf]  ;;  %v2468_v21 = vld [vmem:[%s2445_s6 + $0x10] sm:$0xf] }
  0x13   : > { %v2027_v15 = vcombine.low %v2453_v13, %v2456_v14  ;;  %v2319_v17 = vld [vmem:[%s2445_s6 + $0xd8] ss:$8 sps:$4 sm:$0xff]   ;;  %v2476_v23 = vld [vmem:[%s2445_s6 + $0x90] sm:$0xf]  ;;  %v277_v27 = vld [vmem:[%s2445_s6 + $0x94] sm:$0x1] }
  0x14   : > { %2077 = vmatmul.mubr.msk.bf16.vlgmr.msra.gmra.mrb[0].mxu0 %vm344_vm1, %v2319_v17  ;;  %v2471_v22 = vld [vmem:[%s2445_s6 + $0x18] sm:$0xf]  ;;  %v2322_v25 = vld [vmem:[%s2445_s6 + $0xe8] ss:$8 sps:$4 sm:$0xff]   ;;  %v2483_v26 = vld [vmem:[%s2445_s6 + $0x20] sm:$0xf] }
  0x15   : > { %2033 = vmatmul.mubr.msk.bf16.vlgmr.msra.gmra.mrb[0].mxu1 %vm344_vm1, %v2027_v15  ;;  %1266 = vmatpush1.bf16.msra.mxu0 %v1260_v18  ;;  %v2028_v24 = vcombine.low %v2468_v21, %v2471_v22  ;;  %v2488_v28 = vld [vmem:[%s2445_s6 + $0x28] sm:$0xf]  ;;  %v2491_v29 = vld [vmem:[%s2445_s6 + $0x98] sm:$0xf]  ;;  %v1113_v30 = vshrl.u32 %v2476_v23, 16  ;;  %v1116_v32 = vshll.u32 %v2476_v23, 16 }
  0x16   : > { %503 = vmatpush1.bf16.msra.mxu1 %v497_v16  ;;  %406 = vmatprep.mubr.bf16.mxu1 %v2366_v4  ;;  %v279_v31 = vld [vmem:[%s2445_s6 + $0x9c] sm:$0x1]  ;;  %v1122_v33 = vshll.u32 %v277_v27, 16  ;;  %v1127_v34 = vshrl.u32 %v2491_v29, 16  ;;  %v1130_v35 = vshll.u32 %v2491_v29, 16  ;;  %v2060_v38 = vcombine.low %v2476_v23, %v2491_v29 }
  0x17   : > { %1065 = vmatprep.mubr.bf16.mxu0 %v2366_v4  ;;  %2098 = vmatprep.subr.msk.bf16.mxu0 %vm357_vm0, %v1370_v19  ;;  %v1115_v36 = vrot.slane %v1113_v30, 4  ;;  %v1136_v37 = vshll.u32 %v279_v31, 16  ;;  %v1118_v39 = vrot.slane %v1116_v32, 5  ;;  %v2503_v43 = vld [vmem:[%s2445_s6 + $0xa0] sm:$0xf]  ;;  %v2029_v44 = vcombine.low %v2483_v26, %v2488_v28 }
  0x18   : > { %2054 = vmatprep.subr.msk.bf16.mxu1 %vm357_vm0, %v728_v20  ;;  %v1129_v40 = vrot.slane %v1127_v34, 4  ;;  %v1132_v41 = vrot.slane %v1130_v35, 5  ;;  %v281_v45 = vld [vmem:[%s2445_s6 + $0xa4] sm:$0x1]  ;;  %v1124_v48 = vrot.slane %v1122_v33, 5  ;;  %v1141_v54 = vshrl.u32 %v2503_v43, 16 }
  0x19   : > { %v1119_v47 = vor.u32 %v1118_v39, %v1115_v36  ;;  %v1138_v50 = vrot.slane %v1136_v37, 5  ;;  %v2517_v51 = vld [vmem:[%s2445_s6 + $0xa8] sm:$0xf]  ;;  %v283_v52 = vld [vmem:[%s2445_s6 + $0xac] sm:$0x1]  ;;  %v1144_v55 = vshll.u32 %v2503_v43, 16 }
  0x1a   : > { %v1133_v49 = vor.u32 %v1132_v41, %v1129_v40  ;;  %v1150_v56 = vshll.u32 %v281_v45, 16  ;;  %v1155_v57 = vshrl.u32 %v2517_v51, 16  ;;  %v1158_v60 = vshll.u32 %v2517_v51, 16  ;;  %v2531_v1 = vld [vmem:[%s2445_s6 + $0xb0] sm:$0xf] }
  0x1b   : > { %v1120_v58 = vrot.slane %v1119_v47, 4  ;;  %v1164_v61 = vshll.u32 %v283_v52, 16  ;;  %v1143_v62 = vrot.slane %v1141_v54, 4  ;;  %v1146_v63 = vrot.slane %v1144_v55, 5  ;;  %v285_v10 = vld [vmem:[%s2445_s6 + $0xb4] sm:$0x1] }
  0x1c   : > { %2078 = vmatmul.mubr.msk.bf16.gmra.mrb[4].mxu0 %vm344_vm1, %v2322_v25  ;;  %v1134_v59 = vrot.slane %v1133_v49, 4  ;;  %v1157_v0 = vrot.slane %v1155_v57, 4  ;;  %v1152_v8 = vrot.slane %v1150_v56, 5  ;;  %v1160_v9 = vrot.slane %v1158_v60, 5  ;;  %v2541_v11 = vld [vmem:[%s2445_s6 + $0xb8] sm:$0xf] }
  0x1d   : > { %2034 = vmatmul.mubr.msk.bf16.gmra.mrb[4].mxu1 %vm344_vm1, %v2028_v24  ;;  %1297 = vmatprep.mubr.bf16.mxu0 %v2366_v4  ;;  %v1125_v3 = vsel %vm2522_vm4, %v1120_v58, %v1124_v48  ;;  %v2544_v16 = vld [vmem:[%s2445_s6 + $0x30] sm:$0xf]  ;;  %v1147_v17 = vor.u32 %v1146_v63, %v1143_v62  ;;  %v1166_v18 = vrot.slane %v1164_v61, 5  ;;  %v287_v19 = vld [vmem:[%s2445_s6 + $0xbc] sm:$0x1]  ;;  %v1169_v20 = vshrl.u32 %v2531_v1, 16 }
  0x1e   : > { %416 = vmatprep.mubr.bf16.mxu1 %v2366_v4  ;;  %v1139_v7 = vsel %vm2522_vm4, %v1134_v59, %v1138_v50  ;;  %v2550_v24 = vld [vmem:[%s2445_s6 + $0x38] sm:$0xf]  ;;  %v1161_v25 = vor.u32 %v1160_v9, %v1157_v0  ;;  %v1172_v27 = vshll.u32 %v2531_v1, 16  ;;  %v1178_v30 = vshll.u32 %v285_v10, 16  ;;  %v2558_v36 = vld [vmem:[%s2445_s6 + $0xc0] sm:$0xf] }
  0x1f   : > { %v2082_v15 = vcombine.low %v1125_v3, %v1139_v7  ;;  %v1183_v31 = vshrl.u32 %v2541_v11, 16  ;;  %v1148_v32 = vrot.slane %v1147_v17, 4  ;;  %v1171_v33 = vrot.slane %v1169_v20, 4  ;;  %v2566_v47 = vld [vmem:[%s2445_s6 + $0xc8] sm:$0xf] }
  0x20   : > { %v1186_v34 = vshll.u32 %v2541_v11, 16  ;;  %v1192_v35 = vshll.u32 %v287_v19, 16  ;;  %v1162_v37 = vrot.slane %v1161_v25, 4  ;;  %v1174_v39 = vrot.slane %v1172_v27, 5  ;;  %v289_v56 = vld [vmem:[%s2445_s6 + $0xc4] sm:$0x1] }
  0x21   : > { %v1185_v40 = vrot.slane %v1183_v31, 4  ;;  %v2030_v41 = vcombine.low %v2544_v16, %v2550_v24  ;;  %v1180_v49 = vrot.slane %v1178_v30, 5  ;;  %v1197_v50 = vshrl.u32 %v2558_v36, 16  ;;  %v291_v59 = vld [vmem:[%s2445_s6 + $0xcc] sm:$0x1] }
  0x22   : > { %v1188_v45 = vrot.slane %v1186_v34, 5  ;;  %v1175_v48 = vor.u32 %v1174_v39, %v1171_v33  ;;  %v1194_v55 = vrot.slane %v1192_v35, 5  ;;  %v1200_v57 = vshll.u32 %v2558_v36, 16  ;;  %v267_v7 = vld [vmem:[%s2445_s6 + $0x48] sm:$0xf] }
  0x23   : > { %v1199_v60 = vrot.slane %v1197_v50, 4  ;;  %v1211_v61 = vshrl.u32 %v2566_v47, 16  ;;  %v1214_v62 = vshll.u32 %v2566_v47, 16  ;;  %v1206_v9 = vshll.u32 %v289_v56, 16  ;;  %v2340_v29 = vld [vmem:[%s2445_s6 + $0xf8] ss:$8 sps:$4 sm:$0xff]  }
  0x24   : > { %2088 = vmatmul.mubr.msk.bf16.vlgmr.msra.gmra.mrb[0].mxu0 %vm344_vm1, %v2082_v15  ;;  %v1189_v54 = vor.u32 %v1188_v45, %v1185_v40  ;;  %v1176_v58 = vrot.slane %v1175_v48, 4  ;;  %v1202_v0 = vrot.slane %v1200_v57, 5  ;;  %v1220_v10 = vshll.u32 %v291_v59, 16  ;;  %v2612_v45 = vld [vmem:[%s2445_s6 + $0x40] sm:$0xf] }
  0x25   : > { %2035 = vmatmul.mubr.msk.bf16.gmra.mrb[8].mxu1 %vm344_vm1, %v2029_v44  ;;  %1390 = vmatpush1.bf16.msra.mxu0 %v1384_v42  ;;  %v1153_v44 = vsel %vm2522_vm4, %v1148_v32, %v1152_v8  ;;  %v1167_v42 = vsel %vm2522_vm4, %v1162_v37, %v1166_v18  ;;  %v1216_v3 = vrot.slane %v1214_v62, 5  ;;  %v2582_v8 = vld [vmem:[%s2445_s6 + $0x50] sm:$0xf]  ;;  %v742_v27 = vsel %vm357_vm0, %v2450_v12, 0  ;;  %v2605_v12 = vld [vmem:[%s2445_s6 + $0x58] sm:$0xf] }
  0x26   : > { %426 = vmatprep.mubr.bf16.mxu1 %v2366_v4  ;;  %1307 = vmatprep.mubr.bf16.mxu0 %v2366_v4  ;;  %v2083_v52 = vcombine.low %v1153_v44, %v1167_v42  ;;  %v1190_v63 = vrot.slane %v1189_v54, 4  ;;  %v1181_v15 = vsel %vm2522_vm4, %v1176_v58, %v1180_v49  ;;  %v1203_v18 = vor.u32 %v1202_v0, %v1199_v60  ;;  %v2593_v25 = vld.sshfl [vmem:[%s2855_s1 + $0xc] sm:$0x33 pattern:$0x76325410] }
  0x27   : > { %2109 = vmatprep.subr.msk.bf16.mxu0 %vm357_vm0, %v1494_v2  ;;  %v1213_v2 = vrot.slane %v1211_v61, 4  ;;  %v2038_v20 = vcombine.low %v267_v7, %v2582_v8  ;;  %v1208_v32 = vrot.slane %v1206_v9, 5  ;;  %v1222_v34 = vrot.slane %v1220_v10, 5  ;;  %v2609_v44 = vld [vmem:[%s2445_s6 + $0x60] sm:$0xf] }
  0x28   : > { %v1195_v17 = vsel %vm2522_vm4, %v1190_v63, %v1194_v55  ;;  %v1204_v31 = vrot.slane %v1203_v18, 4  ;;  %v595_v35 = vshrl.u32 %v2453_v13, 16  ;;  %v665_v37 = vshrl.u32 %v2488_v28, 16  ;;  %v262_v58 = vld [vmem:[%s2445_s6 + $0x34] sm:$0x1] }
  0x29   : > { %v1217_v19 = vor.u32 %v1216_v3, %v1213_v2  ;;  %v2084_v30 = vcombine.low %v1181_v15, %v1195_v17  ;;  %v866_v39 = vcombine.high %v2593_v25, %v2593_v25  ;;  %v668_v40 = vshll.u32 %v2488_v28, 16  ;;  %v264_v63 = vld [vmem:[%s2445_s6 + $0x3c] sm:$0x1]  ;;  %v2635_v18 = vld [vmem:[%s2445_s6 + $0x68] sm:$0xf] }
  0x2a   : > { %v682_v42 = vshll.u32 %v2544_v16, 16  ;;  %v1209_v48 = vsel %vm2522_vm4, %v1204_v31, %v1208_v32  ;;  %v1603_v50 = vshrl.u32 %v2612_v45, 16  ;;  %v693_v54 = vshrl.u32 %v2550_v24, 16 }
  0x2b   : > { %v1218_v33 = vrot.slane %v1217_v19, 4  ;;  %v696_v55 = vshll.u32 %v2550_v24, 16  ;;  %v1606_v56 = vshll.u32 %v2612_v45, 16  ;;  %v667_v57 = vrot.slane %v665_v37, 4 }
  0x2c   : > { %2089 = vmatmul.mubr.msk.bf16.gmra.mrb[4].mxu0 %vm344_vm1, %v2083_v52  ;;  %v260_v52 = vld [vmem:[%s2445_s6 + $0x2c] sm:$0x1]  ;;  %v598_v59 = vshll.u32 %v2453_v13, 16  ;;  %v609_v60 = vshrl.u32 %v2456_v14, 16  ;;  %v2039_v61 = vcombine.low %v2605_v12, %v2609_v44  ;;  %v670_v62 = vrot.slane %v668_v40, 5 }
  0x2d   : > { %2036 = vmatmul.mubr.msk.bf16.gmra.mrb[12].mxu1 %vm344_vm1, %v2030_v41  ;;  %1317 = vmatprep.mubr.bf16.mxu0 %v2366_v4  ;;  %v679_v41 = vshrl.u32 %v2544_v16, 16  ;;  %v1223_v49 = vsel %vm2522_vm4, %v1218_v33, %v1222_v34  ;;  %v612_v0 = vshll.u32 %v2456_v14, 16  ;;  %v674_v3 = vshll.u32 %v260_v52, 16 }
  0x2e   : > { %534 = vmatprep.mubr.bf16.mxu1 %v2366_v4  ;;  %v2085_v2 = vcombine.low %v1209_v48, %v1223_v49  ;;  %v1605_v9 = vrot.slane %v1603_v50, 4  ;;  %v671_v10 = vor.u32 %v670_v62, %v667_v57  ;;  %v684_v15 = vrot.slane %v682_v42, 5  ;;  %v266_v42 = vld [vmem:[%s2445_s6 + $0x44] sm:$0x1] }
  0x2f   : > { %v681_v7 = vrot.slane %v679_v41, 4  ;;  %v688_v17 = vshll.u32 %v262_v58, 16  ;;  %v1608_v13 = vrot.slane %v1606_v56, 5  ;;  %v695_v19 = vrot.slane %v693_v54, 4 }
  0x30   : > { %v672_v31 = vrot.slane %v671_v10, 4  ;;  %v676_v32 = vrot.slane %v674_v3, 5  ;;  %v597_v37 = vrot.slane %v595_v35, 4  ;;  %v611_v48 = vrot.slane %v609_v60, 4  ;;  %v250_v3 = vld [vmem:[%s2445_s6 + $0x4] sm:$0x1] }
  0x31   : > { %v685_v33 = vor.u32 %v684_v15, %v681_v7  ;;  %v690_v34 = vrot.slane %v688_v17, 5  ;;  %v614_v49 = vrot.slane %v612_v0, 5  ;;  %v2061_v52 = vcombine.low %v2503_v43, %v2517_v51  ;;  %v2660_v58 = vld.sshfl [vmem:[%s2855_s1 + $0x20] sm:$0x33 pattern:$0x76325410] }
  0x32   : > { %v2063_v56 = vcombine.low %v2558_v36, %v2566_v47  ;;  %v2655_v57 = vsel %vm2522_vm4, %v672_v31, %v676_v32  ;;  %v1609_v60 = vor.u32 %v1608_v13, %v1605_v9  ;;  %v2093_v62 = vcombine.low %v2456_v14, %v2468_v21  ;;  %v252_v7 = vld [vmem:[%s2445_s6 + $0xc] sm:$0x1]  ;;  %v2692_v32 = vld [vmem:[%s2445_s6 + $0x78] sm:$0xf] }
  0x33   : > { %v686_v50 = vrot.slane %v685_v33, 4  ;;  %v623_v17 = vshrl.u32 %v2468_v21, 16  ;;  %v1631_v13 = vcombine.high %v2660_v58, %v2660_v58  ;;  %v604_v33 = vshll.u32 %v250_v3, 16 }
  0x34   : > { %2090 = vmatmul.mubr.msk.bf16.gmra.mrb[8].mxu0 %vm344_vm1, %v2084_v30  ;;  %v2639_v30 = vld [vmem:[%s2445_s6 + $0x70] sm:$0xf]  ;;  %v1610_v10 = vrot.slane %v1609_v60, 4  ;;  %v654_v3 = vshll.u32 %v2483_v26, 16  ;;  %v2105_v53 = vcombine.low %v2609_v44, %v2635_v18  ;;  %v302_v43 = vlaneseq }
  0x35   : > { %2044 = vmatmul.mubr.msk.bf16.vlgmr.msra.gmra.mrb[0].mxu1 %vm344_vm1, %v2038_v20  ;;  %1327 = vmatprep.mubr.bf16.mxu0 %v2366_v4  ;;  %v698_v20 = vrot.slane %v696_v55, 5  ;;  %v2040_v35 = vcombine.low %v2635_v18, %v2639_v30  ;;  %v2062_v55 = vcombine.low %v2531_v1, %v2541_v11 }
  0x36   : > { %748 = vmatpush1.bf16.msra.mxu1 %v742_v27  ;;  %544 = vmatprep.mubr.bf16.mxu1 %v2366_v4  ;;  %v702_v27 = vshll.u32 %v264_v63, 16  ;;  %v1508_v63 = vsel %vm357_vm0, %v2513_v46, 0  ;;  %v626_v46 = vshll.u32 %v2468_v21, 16  ;;  %v2695_v21 = vld [vmem:[%s2445_s6 + $0x80] sm:$0xf]  ;;  %v303_v47 = vshrl.u32 %v302_v43, 7 }
  0x37   : > { %2065 = vmatprep.subr.msk.bf16.mxu1 %vm357_vm0, %v866_v39  ;;  %v600_v39 = vrot.slane %v598_v59, 5  ;;  %v699_v40 = vor.u32 %v698_v20, %v695_v19  ;;  %v2664_v59 = vsel %vm2522_vm4, %v686_v50, %v690_v34  ;;  %v615_v19 = vor.u32 %v614_v49, %v611_v48 }
  0x38   : > { %v704_v41 = vrot.slane %v702_v27, 5  ;;  %v637_v20 = vshrl.u32 %v2471_v22, 16  ;;  %v640_v27 = vshll.u32 %v2471_v22, 16  ;;  %v618_v34 = vshll.u32 %v252_v7, 16 }
  0x39   : > { %v700_v54 = vrot.slane %v699_v40, 4  ;;  %v601_v14 = vor.u32 %v600_v39, %v597_v37  ;;  %v625_v40 = vrot.slane %v623_v17, 4  ;;  %v2094_v48 = vcombine.low %v2471_v22, %v2483_v26 }
  0x3a   : > { %v628_v49 = vrot.slane %v626_v46, 5  ;;  %v606_v50 = vrot.slane %v604_v33, 5  ;;  %v639_v60 = vrot.slane %v637_v20, 4  ;;  %v2095_v46 = vcombine.low %v2488_v28, %v2544_v16 }
  0x3b   : > { %v2672_v0 = vsel %vm2522_vm4, %v700_v54, %v704_v41  ;;  %v602_v39 = vrot.slane %v601_v14, 4  ;;  %v616_v41 = vrot.slane %v615_v19, 4  ;;  %v254_v54 = vld [vmem:[%s2445_s6 + $0x14] sm:$0x1]  ;;  %v656_v33 = vrot.slane %v654_v3, 5 }
  0x3c   : > { %2091 = vmatmul.mubr.msk.bf16.gmra.mrb[12].mxu0 %vm344_vm1, %v2085_v2  ;;  %v2117_v2 = vcombine.low %v2655_v57, %v2664_v59  ;;  %v2052_v9 = vcombine.low %v2664_v59, %v2672_v0  ;;  %v629_v7 = vor.u32 %v628_v49, %v625_v40 }
  0x3d   : > { %2045 = vmatmul.mubr.msk.bf16.gmra.mrb[4].mxu1 %vm344_vm1, %v2039_v61  ;;  %1421 = vmatprep.mubr.bf16.mxu0 %v2366_v4  ;;  %v1612_v61 = vshll.u32 %v266_v42, 16  ;;  %v2041_v42 = vcombine.low %v2692_v32, %v2695_v21  ;;  %v607_v22 = vsel %vm2522_vm4, %v602_v39, %v606_v50  ;;  %v258_v39 = vld [vmem:[%s2445_s6 + $0x24] sm:$0x1] }
  0x3e   : > { %554 = vmatprep.mubr.bf16.mxu1 %v2366_v4 }
  0x3f   : > { %v1614_v15 = vrot.slane %v1612_v61, 5  ;;  %v642_v61 = vrot.slane %v640_v27, 5 }
  0x41   : > { %v1615_v31 = vsel %vm2522_vm4, %v1610_v10, %v1614_v15  ;;  %v632_v10 = vshll.u32 %v254_v54, 16  ;;  %v643_v14 = vor.u32 %v642_v61, %v639_v60 }
  0x42   : > { %v2698_v37 = vcombine.low %v2672_v0, %v1615_v31 }
  0x43   : > { %v634_v19 = vrot.slane %v632_v10, 5  ;;  %v644_v20 = vrot.slane %v643_v14, 4 }
  0x44   : > { %2099 = vmatmul.mubr.msk.bf16.vlgmr.msra.gmra.mrb[0].mxu0 %vm344_vm1, %v2093_v62  ;;  %v256_v62 = vld [vmem:[%s2445_s6 + $0x1c] sm:$0x1] }
  0x45   : > { %2046 = vmatmul.mubr.msk.bf16.gmra.mrb[8].mxu1 %vm344_vm1, %v2040_v35  ;;  %1514 = vmatpush1.bf16.msra.mxu0 %v1508_v63  ;;  %v620_v35 = vrot.slane %v618_v34, 5  ;;  %v651_v63 = vshrl.u32 %v2483_v26, 16  ;;  %v646_v17 = vshll.u32 %v256_v62, 16  ;;  %v880_v34 = vsel %vm357_vm0, %v2593_v25, 0 }
  0x46   : > { %564 = vmatprep.mubr.bf16.mxu1 %v2366_v4  ;;  %1431 = vmatprep.mubr.bf16.mxu0 %v2366_v4 }
  0x47   : > { %2120 = vmatprep.subr.msk.bf16.mxu0 %vm357_vm0, %v1631_v13  ;;  %v621_v15 = vsel %vm2522_vm4, %v616_v41, %v620_v35  ;;  %v630_v13 = vrot.slane %v629_v7, 4  ;;  %v648_v27 = vrot.slane %v646_v17, 5  ;;  %v653_v31 = vrot.slane %v651_v63, 4 }
  0x48   : > { %v2049_v26 = vcombine.low %v607_v22, %v621_v15  ;;  %v660_v41 = vshll.u32 %v258_v39, 16 }
  0x49   : > { %v635_v40 = vsel %vm2522_vm4, %v630_v13, %v634_v19  ;;  %v649_v28 = vsel %vm2522_vm4, %v644_v20, %v648_v27  ;;  %v657_v16 = vor.u32 %v656_v33, %v653_v31 }
  0x4a   : > { %v2050_v25 = vcombine.low %v635_v40, %v649_v28  ;;  %v662_v49 = vrot.slane %v660_v41, 5 }
  0x4c   : > { %2100 = vmatmul.mubr.msk.bf16.gmra.mrb[4].mxu0 %vm344_vm1, %v2094_v48  ;;  %v658_v48 = vrot.slane %v657_v16, 4 }
  0x4d   : > { %2047 = vmatmul.mubr.msk.bf16.gmra.mrb[12].mxu1 %vm344_vm1, %v2041_v42  ;;  %1441 = vmatprep.mubr.bf16.mxu0 %v2366_v4  ;;  %v2096_v42 = vcombine.low %v2550_v24, %v2612_v45  ;;  %v1645_v24 = vsel %vm357_vm0, %v2660_v58, 0  ;;  %v304_v45 = vsub.s32 0, %v303_v47 }
  0x4e   : > { %779 = vmatprep.mubr.bf16.mxu1 %v2366_v4  ;;  %v663_v50 = vsel %vm2522_vm4, %v658_v48, %v662_v49 }
  0x4f   : > { %v2051_v35 = vcombine.low %v663_v50, %v2655_v57  ;;  %v2116_v23 = vcombine.low %v649_v28, %v663_v50 }
  0x54   : > { %2101 = vmatmul.mubr.msk.bf16.gmra.mrb[8].mxu0 %vm344_vm1, %v2095_v46 }
  0x55   : > { %2055 = vmatmul.mubr.msk.bf16.vlgmr.msra.gmra.mrb[0].mxu1 %vm344_vm1, %v2049_v26  ;;  %1451 = vmatprep.mubr.bf16.mxu0 %v2366_v4 }
  0x56   : > { %886 = vmatpush1.bf16.msra.mxu1 %v880_v34  ;;  %789 = vmatprep.mubr.bf16.mxu1 %v2366_v4 }
  0x57   : > { %2146 = vmatprep.subr.msk.bf16.mxu1 %vm357_vm0, %v2419_v5  ;;  %v2104_v5 = vcombine.low %v2582_v8, %v2605_v12  ;;  %v2106_v8 = vcombine.low %v2639_v30, %v2692_v32  ;;  %v275_v12 = vld [vmem:[%s2445_s6 + $0x88] sm:$0xf]  ;;  %v300_v30 = vld [vmem:[%s2856_s2] sm:$0x3] }
  0x58   : > { %v2107_v44 = vcombine.low %v2695_v21, %v275_v12  ;;  %v2807_v57 = vrot.slane %v300_v30, %v304_v45 }
  0x5c   : > { %2102 = vmatmul.mubr.msk.bf16.gmra.mrb[12].mxu0 %vm344_vm1, %v2096_v42 }
  0x5d   : > { %2056 = vmatmul.mubr.msk.bf16.gmra.mrb[4].mxu1 %vm344_vm1, %v2050_v25  ;;  %1545 = vmatprep.mubr.bf16.mxu0 %v2366_v4 }
  0x5e   : > { %799 = vmatprep.mubr.bf16.mxu1 %v2366_v4 }
  0x64   : > { %2110 = vmatmul.mubr.msk.bf16.vlgmr.msra.gmra.mrb[0].mxu0 %vm344_vm1, %v2104_v5 }
  0x65   : > { %2057 = vmatmul.mubr.msk.bf16.gmra.mrb[8].mxu1 %vm344_vm1, %v2051_v35  ;;  %1651 = vmatpush1.bf16.msra.mxu0 %v1645_v24 }
  0x66   : > { %809 = vmatprep.mubr.bf16.mxu1 %v2366_v4  ;;  %1555 = vmatprep.mubr.bf16.mxu0 %v2366_v4 }
  0x6c   : > { %2111 = vmatmul.mubr.msk.bf16.gmra.mrb[4].mxu0 %vm344_vm1, %v2105_v53 }
  0x6d   : > { %2058 = vmatmul.mubr.msk.bf16.gmra.mrb[12].mxu1 %vm344_vm1, %v2052_v9  ;;  %1565 = vmatprep.mubr.bf16.mxu0 %v2366_v4 }
  0x6e   : > { %917 = vmatprep.mubr.bf16.mxu1 %v2366_v4 }
  0x74   : > { %2112 = vmatmul.mubr.msk.bf16.gmra.mrb[8].mxu0 %vm344_vm1, %v2106_v8 }
  0x75   : > { %2066 = vmatmul.mubr.msk.bf16.vlgmr.msra.gmra.mrb[0].mxu1 %vm344_vm1, %v2060_v38  ;;  %1575 = vmatprep.mubr.bf16.mxu0 %v2366_v4  ;;  %v2341_v38 = vld [vmem:[%s2445_s6 + $0x108] ss:$8 sps:$4 sm:$0xff]  }
  0x76   : > { %2147 = vmatpush1.bf16.msra.mxu1 %v2422_v6  ;;  %927 = vmatprep.mubr.bf16.mxu1 %v2366_v4  ;;  %v2115_v6 = vcombine.low %v621_v15, %v635_v40 }
  0x7c   : > { %2113 = vmatmul.mubr.msk.bf16.gmra.mrb[12].mxu0 %vm344_vm1, %v2107_v44 }
  0x7d   : > { %2067 = vmatmul.mubr.msk.bf16.gmra.mrb[4].mxu1 %vm344_vm1, %v2061_v52  ;;  %1682 = vmatprep.mubr.bf16.mxu0 %v2366_v4 }
  0x7e   : > { %937 = vmatprep.mubr.bf16.mxu1 %v2366_v4 }
  0x84   : > { %2121 = vmatmul.mubr.msk.bf16.vlgmr.msra.gmra.mrb[0].mxu0 %vm344_vm1, %v2115_v6 }
  0x85   : > { %2068 = vmatmul.mubr.msk.bf16.gmra.mrb[8].mxu1 %vm344_vm1, %v2062_v55  ;;  %1692 = vmatprep.mubr.bf16.mxu0 %v2366_v4 }
  0x86   : > { %947 = vmatprep.mubr.bf16.mxu1 %v2366_v4 }
  0x8c   : > { %2122 = vmatmul.mubr.msk.bf16.gmra.mrb[4].mxu0 %vm344_vm1, %v2116_v23 }
  0x8d   : > { %2069 = vmatmul.mubr.msk.bf16.gmra.mrb[12].mxu1 %vm344_vm1, %v2063_v56  ;;  %1702 = vmatprep.mubr.bf16.mxu0 %v2366_v4 }
  0x8e   : > { %1075 = vmatprep.mubr.bf16.mxu1 %v2366_v4 }
  0x94   : > { %2123 = vmatmul.mubr.msk.bf16.gmra.mrb[8].mxu0 %vm344_vm1, %v2117_v2 }
  0x95   : > { %2079 = vmatmul.mubr.msk.bf16.vlgmr.msra.gmra.mrb[8].mxu1 %vm344_vm1, %v2340_v29  ;;  %1712 = vmatprep.mubr.bf16.mxu0 %v2366_v4 }
  0x96   : > { %1085 = vmatprep.mubr.bf16.mxu1 %v2366_v4  ;;  %v308_v4 = vsub.s32 1, %v303_v47 }
  0x98   : > { %v2809_v58 = vrot.slane %v300_v30, %v308_v4 }
  0x9c   : > { %2124 = vmatmul.mubr.msk.bf16.gmra.mrb[12].mxu0 %vm344_vm1, %v2698_v37 }
  0x9d   : > { %2080 = vmatmul.mubr.msk.bf16.gmra.mrb[12].mxu1 %vm344_vm1, %v2341_v38 }
 0x148   : > { %v919_v51 = vpop.f32.mrb[0].mxu1 }
 0x149   : > { %v921_v1 = vpop.f32.mrb[1].mxu1  ;;  %v2148_v59 = vadd.f32 %v919_v51, %v2807_v57 }
 0x14a   : > { %v923_v11 = vpop.f32.mrb[2].mxu1  ;;  %v2150_v0 = vadd.f32 %v921_v1, %v2809_v58 }
 0x14b   : > { %v925_v36 = vpop.f32.mrb[3].mxu1  ;;  %v2152_v9 = vadd.f32 %v923_v11, %v2807_v57 }
 0x14c   : > { %v2154_v37 = vadd.f32 %v925_v36, %v2809_v58 }
 0x150   : > { %v929_v18 = vpop.f32.mrb[4].mxu1 }
 0x151   : > { %v931_v52 = vpop.f32.mrb[5].mxu1  ;;  %v2156_v46 = vadd.f32 %v929_v18, %v2807_v57 }
 0x152   : > { %v933_v55 = vpop.f32.mrb[6].mxu1  ;;  %v2158_v19 = vadd.f32 %v931_v52, %v2809_v58 }
 0x153   : > { %v935_v56 = vpop.f32.mrb[7].mxu1  ;;  %v2160_v31 = vadd.f32 %v933_v55, %v2807_v57 }
 0x154   : > { %v2162_v39 = vadd.f32 %v935_v56, %v2809_v58 }
 0x157   : > { %v1684_v2 = vpop.f32.mrb[0].mxu0 }
 0x158   : > { %v2149_v32 = vadd.f32 %v2148_v59, %v1684_v2  ;;  %v1686_v21 = vpop.f32.mrb[1].mxu0 }
 0x159   : > { %v2151_v54 = vadd.f32 %v2150_v0, %v1686_v21  ;;  %v1688_v60 = vpop.f32.mrb[2].mxu0 }
 0x15a   : > { %v2153_v61 = vadd.f32 %v2152_v9, %v1688_v60  ;;  %v1690_v62 = vpop.f32.mrb[3].mxu0  ;;  %v1837_v7 = vmul.f32 %v2149_v32, %v2149_v32 }
 0x15b   : > { %v2138_v63 = vpack.c.bf16 %v2151_v54, %v2149_v32  ;;  %v2155_v3 = vadd.f32 %v2154_v37, %v1690_v62  ;;  %v1838_v15 = vmul.f32 %v2151_v54, %v2151_v54 }
 0x15c   : > { %v1811_v10 = vadd.f32 %v2153_v61, %v2149_v32  ;;  %v1839_v22 = vmul.f32 %v2153_v61, %v2153_v61 }
 0x15d   : > { %1803 = vst [vmem:[%s2819_s24] sm:$0xff] %v2138_v63  ;;  %v2139_v14 = vpack.c.bf16 %v2155_v3, %v2153_v61  ;;  %v1824_v17 = vadd.f32 %v2155_v3, %v2151_v54  ;;  %v1840_v26 = vmul.f32 %v2155_v3, %v2155_v3 }
 0x15e   : > { %v1853_v13 = vadd.f32 %v1839_v22, %v1837_v7 }
 0x15f   : > { %1804 = vst [vmem:[%s2819_s24 + $0x8] sm:$0xff] %v2139_v14  ;;  %v1866_v20 = vadd.f32 %v1840_v26, %v1838_v15  ;;  %v1694_v27 = vpop.f32.mrb[4].mxu0 }
 0x160   : > { %v2157_v33 = vadd.f32 %v2156_v46, %v1694_v27  ;;  %v1696_v34 = vpop.f32.mrb[5].mxu0 }
 0x161   : > { %v2159_v40 = vadd.f32 %v2158_v19, %v1696_v34  ;;  %v1698_v28 = vpop.f32.mrb[6].mxu0 }
 0x162   : > { %v1812_v16 = vadd.f32 %v2157_v33, %v1811_v10  ;;  %v1841_v41 = vmul.f32 %v2157_v33, %v2157_v33  ;;  %v2161_v25 = vadd.f32 %v2160_v31, %v1698_v28  ;;  %v1700_v42 = vpop.f32.mrb[7].mxu0 }
 0x163   : > { %v2140_v48 = vpack.c.bf16 %v2159_v40, %v2157_v33  ;;  %v1825_v49 = vadd.f32 %v2159_v40, %v1824_v17  ;;  %v1842_v50 = vmul.f32 %v2159_v40, %v2159_v40  ;;  %v2163_v35 = vadd.f32 %v2162_v39, %v1700_v42 }
 0x164   : > { %v1854_v5 = vadd.f32 %v1853_v13, %v1841_v41  ;;  %v1813_v24 = vadd.f32 %v2161_v25, %v1812_v16  ;;  %v1843_v53 = vmul.f32 %v2161_v25, %v2161_v25 }
 0x165   : > { %1805 = vst [vmem:[%s2819_s24 + $0x10] sm:$0xff] %v2140_v48  ;;  %v1867_v8 = vadd.f32 %v1866_v20, %v1842_v50  ;;  %v2141_v12 = vpack.c.bf16 %v2163_v35, %v2161_v25  ;;  %v1826_v44 = vadd.f32 %v2163_v35, %v1825_v49  ;;  %v1844_v6 = vmul.f32 %v2163_v35, %v2163_v35 }
 0x166   : > { %v1855_v23 = vadd.f32 %v1854_v5, %v1843_v53 }
 0x167   : > { %1806 = vst [vmem:[%s2819_s24 + $0x18] sm:$0xff] %v2141_v12  ;;  %v1868_v38 = vadd.f32 %v1867_v8, %v1844_v6  ;;  %v1704_v51 = vpop.f32.mrb[8].mxu0 }
 0x168   : > { %v1077_v29 = vpop.f32.mrb[8].mxu1  ;;  %v1706_v36 = vpop.f32.mrb[9].mxu0 }
 0x169   : > { %v2164_v43 = vadd.f32 %v1077_v29, %v2807_v57  ;;  %v1079_v1 = vpop.f32.mrb[9].mxu1  ;;  %v1708_v30 = vpop.f32.mrb[10].mxu0 }
 0x16a   : > { %v2166_v11 = vadd.f32 %v1079_v1, %v2809_v58  ;;  %v1081_v47 = vpop.f32.mrb[10].mxu1  ;;  %v1710_v56 = vpop.f32.mrb[11].mxu0 }
 0x16b   : > { %v2165_v45 = vadd.f32 %v2164_v43, %v1704_v51  ;;  %v2168_v18 = vadd.f32 %v1081_v47, %v2807_v57  ;;  %v1083_v4 = vpop.f32.mrb[11].mxu1 }
 0x16c   : > { %v2167_v52 = vadd.f32 %v2166_v11, %v1706_v36  ;;  %v2170_v55 = vadd.f32 %v1083_v4, %v2809_v58 }
 0x16d   : > { %v1814_v59 = vadd.f32 %v2165_v45, %v1813_v24  ;;  %v1845_v0 = vmul.f32 %v2165_v45, %v2165_v45  ;;  %v2169_v2 = vadd.f32 %v2168_v18, %v1708_v30 }
 0x16e   : > { %v2142_v9 = vpack.c.bf16 %v2167_v52, %v2165_v45  ;;  %v1827_v32 = vadd.f32 %v2167_v52, %v1826_v44  ;;  %v1846_v21 = vmul.f32 %v2167_v52, %v2167_v52  ;;  %v2171_v37 = vadd.f32 %v2170_v55, %v1710_v56 }
 0x16f   : > { %v1856_v54 = vadd.f32 %v1855_v23, %v1845_v0  ;;  %v1815_v60 = vadd.f32 %v2169_v2, %v1814_v59  ;;  %v1847_v61 = vmul.f32 %v2169_v2, %v2169_v2  ;;  %v1714_v14 = vpop.f32.mrb[12].mxu0 }
 0x170   : > { %1807 = vst [vmem:[%s2819_s24 + $0x20] sm:$0xff] %v2142_v9  ;;  %v1869_v62 = vadd.f32 %v1868_v38, %v1846_v21  ;;  %v2143_v63 = vpack.c.bf16 %v2171_v37, %v2169_v2  ;;  %v1828_v3 = vadd.f32 %v2171_v37, %v1827_v32  ;;  %v1848_v7 = vmul.f32 %v2171_v37, %v2171_v37  ;;  %v1087_v10 = vpop.f32.mrb[12].mxu1  ;;  %v1716_v13 = vpop.f32.mrb[13].mxu0 }
 0x171   : > { %v1857_v22 = vadd.f32 %v1856_v54, %v1847_v61  ;;  %v2172_v15 = vadd.f32 %v1087_v10, %v2807_v57  ;;  %v1089_v17 = vpop.f32.mrb[13].mxu1  ;;  %v1718_v31 = vpop.f32.mrb[14].mxu0 }
 0x172   : > { %1808 = vst [vmem:[%s2819_s24 + $0x28] sm:$0xff] %v2143_v63  ;;  %v1870_v26 = vadd.f32 %v1869_v62, %v1848_v7  ;;  %v2174_v46 = vadd.f32 %v1089_v17, %v2809_v58  ;;  %v1091_v19 = vpop.f32.mrb[14].mxu1  ;;  %v1720_v40 = vpop.f32.mrb[15].mxu0 }
 0x173   : > { %v2173_v20 = vadd.f32 %v2172_v15, %v1714_v14  ;;  %v2176_v27 = vadd.f32 %v1091_v19, %v2807_v57  ;;  %v1093_v33 = vpop.f32.mrb[15].mxu1 }
 0x174   : > { %v2175_v34 = vadd.f32 %v2174_v46, %v1716_v13  ;;  %v2178_v39 = vadd.f32 %v1093_v33, %v2809_v58 }
 0x175   : > { %v1816_v28 = vadd.f32 %v2173_v20, %v1815_v60  ;;  %v1849_v16 = vmul.f32 %v2173_v20, %v2173_v20  ;;  %v2177_v41 = vadd.f32 %v2176_v27, %v1718_v31 }
 0x176   : > { %v2144_v25 = vpack.c.bf16 %v2175_v34, %v2173_v20  ;;  %v1829_v42 = vadd.f32 %v2175_v34, %v1828_v3  ;;  %v1850_v48 = vmul.f32 %v2175_v34, %v2175_v34  ;;  %v2179_v49 = vadd.f32 %v2178_v39, %v1720_v40 }
 0x177   : > { %v1858_v50 = vadd.f32 %v1857_v22, %v1849_v16  ;;  %v1817_v35 = vadd.f32 %v2177_v41, %v1816_v28  ;;  %v1851_v5 = vmul.f32 %v2177_v41, %v2177_v41 }
 0x178   : > { %1809 = vst [vmem:[%s2819_s24 + $0x30] sm:$0xff] %v2144_v25  ;;  %v1871_v57 = vadd.f32 %v1870_v26, %v1850_v48  ;;  %v2145_v24 = vpack.c.bf16 %v2179_v49, %v2177_v41  ;;  %v1830_v53 = vadd.f32 %v2179_v49, %v1829_v42  ;;  %v1852_v8 = vmul.f32 %v2179_v49, %v2179_v49 }
 0x179   : > { %v1818_v12 = vrot.slane %v1817_v35, 4  ;;  %v1859_v44 = vadd.f32 %v1858_v50, %v1851_v5 }
 0x17a   : > { %1810 = vst [vmem:[%s2819_s24 + $0x38] sm:$0xff] %v2145_v24  ;;  %v1831_v58 = vrot.slane %v1830_v53, 4  ;;  %v1872_v6 = vadd.f32 %v1871_v57, %v1852_v8 }
 0x17b   : > { %v1819_v23 = vadd.f32 %v1818_v12, %v1817_v35  ;;  %v1860_v29 = vrot.slane %v1859_v44, 4 }
 0x17c   : > { %v1832_v38 = vadd.f32 %v1831_v58, %v1830_v53  ;;  %v1873_v43 = vrot.slane %v1872_v6, 4 }
 0x17d   : > { %v1820_v51 = vrot.slane %v1819_v23, 2  ;;  %v1861_v1 = vadd.f32 %v1860_v29, %v1859_v44 }
 0x17e   : > { %v1833_v11 = vrot.slane %v1832_v38, 2  ;;  %v1874_v36 = vadd.f32 %v1873_v43, %v1872_v6 }
 0x17f   : > { %v1821_v47 = vadd.f32 %v1820_v51, %v1819_v23  ;;  %v1862_v45 = vrot.slane %v1861_v1, 2 }
 0x180   : > { %v1834_v18 = vadd.f32 %v1833_v11, %v1832_v38  ;;  %v1875_v30 = vrot.slane %v1874_v36, 2 }
 0x181   : > { %v1822_v4 = vrot.slane %v1821_v47, 1  ;;  %v1863_v52 = vadd.f32 %v1862_v45, %v1861_v1 }
 0x182   : > { %v1835_v55 = vrot.slane %v1834_v18, 1  ;;  %v1876_v56 = vadd.f32 %v1875_v30, %v1874_v36 }
 0x183   : > { %v1864_v59 = vrot.slane %v1863_v52, 1  ;;  %v1823_v2 = vadd.f32 %v1822_v4, %v1821_v47 }
 0x184   : > { %v1877_v0 = vrot.slane %v1876_v56, 1  ;;  %v1836_v32 = vadd.f32 %v1835_v55, %v1834_v18 }
 0x185   : > { %v1865_v9 = vadd.f32 %v1864_v59, %v1863_v52 }
 0x186   : > { %v1878_v21 = vadd.f32 %v1877_v0, %v1876_v56 }
 0x187   : > { %v1880_v37 = vsel %vm1879_vm5, %v1823_v2, %v1865_v9 }
 0x188   : > { %v1881_v54 = vsel %vm1879_vm5, %v1836_v32, %v1878_v21 }
 0x189   : > { %v1884_v60 = vcombine.low %v1880_v37, %v1881_v54 }
 0x18b   : > { %2133 = vst.sshfl [vmem:[%s246_s28] sm:$0x33 pattern:$0x76325410] %v1884_v60 }
 0x18c PF: > { %s15_s17 = sadd.s32 1, %s2364_s17   ;;  %s2861_s15 = smov %s2360_s16 }
 0x18d   : > { %p12_p5 = scmp.ge.s32.totalorder %s15_s17, 4   ;;  %s2862_s16 = smov %s2864_s18 }
 0x18f   :  { %14 = sbr.rel (!%p12_p5) target bundleno = 2 (0x2), region = 82 }

// kernel: res2d_forward.5
= control target key start
LH: loop header
LB: loop body
LE: loop exit
PB: predicated region body
PF: predicated region fallthrough
CT: control target
= control target key end

     0   :  { %s674_s0 = inlined_call_operand.vmem [shape: bf16[2,8,8,128], index: 0, kind: input, shape index: {}]   ;;  %s675_s1 = inlined_call_operand.vmem [shape: bf16[2,8,8,256], index: 1, kind: input, shape index: {}]   ;;  %s676_s2 = inlined_call_operand.vmem [shape: f32[1,128], index: 2, kind: input, shape index: {}]   ;;  %s677_s3 = inlined_call_operand.vmem [shape: f32[1,128], index: 3, kind: input, shape index: {}]   ;;  %s678_s4 = inlined_call_operand.vmem [shape: f32[1,128], index: 4, kind: input, shape index: {}]   ;;  %s679_s5 = inlined_call_operand.vmem [shape: f32[1,128], index: 5, kind: input, shape index: {}]   ;;  %s680_s6 = inlined_call_operand.vmem [shape: f32[2,8,8,128], index: 6, kind: output, shape index: {}]  }
   0x1   :  { %v337_v0 = vld [vmem:[%s675_s1 + $0x4] sm:$0xf]  ;;  %v338_v1 = vld [vmem:[%s675_s1 + $0xc] sm:$0xf]  ;;  %v339_v2 = vld [vmem:[%s675_s1 + $0x14] sm:$0xf] }
   0x2   :  { %32 = vst [vmem:[#allocation2] sm:$0xf] %v337_v0  ;;  %34 = vst [vmem:[#allocation2 + $0x4] sm:$0xf] %v338_v1  ;;  %v340_v3 = vld [vmem:[%s675_s1 + $0x1c] sm:$0xf] }
   0x3   :  { %36 = vst [vmem:[#allocation2 + $0x8] sm:$0xf] %v339_v2  ;;  %v341_v4 = vld [vmem:[%s675_s1 + $0x24] sm:$0xf]  ;;  %v342_v5 = vld [vmem:[%s675_s1 + $0x2c] sm:$0xf] }
   0x4   :  { %38 = vst [vmem:[#allocation2 + $0xc] sm:$0xf] %v340_v3  ;;  %40 = vst [vmem:[#allocation2 + $0x10] sm:$0xf] %v341_v4  ;;  %v343_v6 = vld [vmem:[%s675_s1 + $0x34] sm:$0xf] }
   0x5   :  { %42 = vst [vmem:[#allocation2 + $0x14] sm:$0xf] %v342_v5  ;;  %v344_v7 = vld [vmem:[%s675_s1 + $0x3c] sm:$0xf]  ;;  %v345_v8 = vld [vmem:[%s675_s1 + $0x44] sm:$0xf] }
   0x6   :  { %44 = vst [vmem:[#allocation2 + $0x18] sm:$0xf] %v343_v6  ;;  %46 = vst [vmem:[#allocation2 + $0x1c] sm:$0xf] %v344_v7  ;;  %v346_v9 = vld [vmem:[%s675_s1 + $0x4c] sm:$0xf] }
   0x7   :  { %48 = vst [vmem:[#allocation2 + $0x20] sm:$0xf] %v345_v8  ;;  %v347_v10 = vld [vmem:[%s675_s1 + $0x54] sm:$0xf]  ;;  %v348_v11 = vld [vmem:[%s675_s1 + $0x5c] sm:$0xf] }
   0x8   :  { %50 = vst [vmem:[#allocation2 + $0x24] sm:$0xf] %v346_v9  ;;  %52 = vst [vmem:[#allocation2 + $0x28] sm:$0xf] %v347_v10  ;;  %v349_v12 = vld [vmem:[%s675_s1 + $0x64] sm:$0xf] }
   0x9   :  { %54 = vst [vmem:[#allocation2 + $0x2c] sm:$0xf] %v348_v11  ;;  %v350_v13 = vld [vmem:[%s675_s1 + $0x6c] sm:$0xf]  ;;  %v351_v14 = vld [vmem:[%s675_s1 + $0x74] sm:$0xf] }
   0xa   :  { %56 = vst [vmem:[#allocation2 + $0x30] sm:$0xf] %v349_v12  ;;  %58 = vst [vmem:[#allocation2 + $0x34] sm:$0xf] %v350_v13  ;;  %v352_v15 = vld [vmem:[%s675_s1 + $0x7c] sm:$0xf] }
   0xb   :  { %60 = vst [vmem:[#allocation2 + $0x38] sm:$0xf] %v351_v14  ;;  %62 = vst [vmem:[#allocation2 + $0x3c] sm:$0xf] %v352_v15  ;;  %v521_v16 = vld [vmem:[%s676_s2] ss:$0 sm:$0xff] }
   0xc   :  { %v358_v17 = vld [vmem:[%s674_s0] sm:$0xff]   ;;  %v421_v20 = vld [vmem:[%s674_s0 + $0x8] sm:$0xff]   ;;  %v422_v21 = vld [vmem:[%s674_s0 + $0x10] sm:$0xff]  }
   0xd   :  { %v359_v18 = vunpack.c.l.bf16 %v358_v17  ;;  %v360_v19 = vunpack.c.h.bf16 %v358_v17  ;;  %v535_v22 = vld [vmem:[%s677_s3] ss:$0 sm:$0xff]  ;;  %v363_v25 = vunpack.c.l.bf16 %v421_v20  ;;  %v364_v26 = vunpack.c.h.bf16 %v421_v20  ;;  %v428_v33 = vld [vmem:[#allocation2 + $0x8] sm:$0xff]   ;;  %v429_v38 = vld [vmem:[#allocation2 + $0x10] sm:$0xff]  }
   0xe   :  { %v540_v23 = vld [vmem:[%s678_s4] ss:$0 sm:$0xff]  ;;  %v367_v27 = vunpack.c.l.bf16 %v422_v21  ;;  %v368_v28 = vunpack.c.h.bf16 %v422_v21  ;;  %v395_v34 = vunpack.c.l.bf16 %v428_v33  ;;  %v396_v36 = vunpack.c.h.bf16 %v428_v33  ;;  %v423_v56 = vld [vmem:[%s674_s0 + $0x18] sm:$0xff]   ;;  %v425_v21 = vld [vmem:[%s674_s0 + $0x28] sm:$0xff]  }
   0xf   :  { %v390_v24 = vld [vmem:[#allocation2] sm:$0xff]   ;;  %v199_v30 = vmul.f32 %v359_v18, %v521_v16  ;;  %v200_v32 = vmul.f32 %v360_v19, %v521_v16  ;;  %v201_v35 = vmul.f32 %v363_v25, %v521_v16  ;;  %v202_v37 = vmul.f32 %v364_v26, %v521_v16  ;;  %v430_v61 = vld [vmem:[#allocation2 + $0x18] sm:$0xff]  }
  0x10   :  { %v391_v29 = vunpack.c.l.bf16 %v390_v24  ;;  %v392_v31 = vunpack.c.h.bf16 %v390_v24  ;;  %v553_v43 = vld [vmem:[%s679_s5] ss:$0 sm:$0xff]  ;;  %v245_v45 = vmul.f32 %v395_v34, %v540_v23  ;;  %v246_v47 = vmul.f32 %v396_v36, %v540_v23 }
  0x11   :  { %v221_v39 = vadd.f32 %v535_v22, %v199_v30  ;;  %v222_v41 = vadd.f32 %v535_v22, %v200_v32  ;;  %v223_v44 = vadd.f32 %v535_v22, %v201_v35  ;;  %v224_v46 = vadd.f32 %v535_v22, %v202_v37  ;;  %v424_v6 = vld [vmem:[%s674_s0 + $0x20] sm:$0xff]  }
  0x12   :  { %v243_v40 = vmul.f32 %v391_v29, %v540_v23  ;;  %v244_v42 = vmul.f32 %v392_v31, %v540_v23  ;;  %v399_v50 = vunpack.c.l.bf16 %v429_v38  ;;  %v203_v51 = vmul.f32 %v367_v27, %v521_v16  ;;  %v431_v7 = vld [vmem:[#allocation2 + $0x20] sm:$0xff]  }
  0x13   :  { %v261_v52 = vadd.f32 %v245_v45, %v223_v44  ;;  %v262_v53 = vadd.f32 %v246_v47, %v224_v46  ;;  %v400_v54 = vunpack.c.h.bf16 %v429_v38  ;;  %v204_v55 = vmul.f32 %v368_v28, %v521_v16  ;;  %v432_v28 = vld [vmem:[#allocation2 + $0x28] sm:$0xff]   ;;  %v426_v46 = vld [vmem:[%s674_s0 + $0x30] sm:$0xff]  }
  0x14   :  { %v259_v48 = vadd.f32 %v243_v40, %v221_v39  ;;  %v260_v49 = vadd.f32 %v244_v42, %v222_v41  ;;  %v225_v59 = vadd.f32 %v535_v22, %v203_v51  ;;  %v247_v60 = vmul.f32 %v399_v50, %v540_v23  ;;  %v433_v51 = vld [vmem:[#allocation2 + $0x30] sm:$0xff]  }
  0x15   :  { %v283_v62 = vadd.f32 %v553_v43, %v261_v52  ;;  %v284_v63 = vadd.f32 %v553_v43, %v262_v53  ;;  %v226_v0 = vadd.f32 %v535_v22, %v204_v55  ;;  %v248_v1 = vmul.f32 %v400_v54, %v540_v23 }
  0x16   :  { %v281_v57 = vadd.f32 %v553_v43, %v259_v48  ;;  %v282_v58 = vadd.f32 %v553_v43, %v260_v49  ;;  %v263_v4 = vadd.f32 %v247_v60, %v225_v59  ;;  %v371_v5 = vunpack.c.l.bf16 %v423_v56 }
  0x17   :  { %v299_v8 = vmax.f32 %v283_v62, 0.0  ;;  %v300_v9 = vmax.f32 %v284_v63, 0.0  ;;  %v264_v10 = vadd.f32 %v248_v1, %v226_v0  ;;  %v403_v11 = vunpack.c.l.bf16 %v430_v61  ;;  %v427_v0 = vld [vmem:[%s674_s0 + $0x38] sm:$0xff]  }
  0x18   :  { %v297_v2 = vmax.f32 %v281_v57, 0.0  ;;  %v298_v3 = vmax.f32 %v282_v58, 0.0  ;;  %v285_v12 = vadd.f32 %v553_v43, %v263_v4  ;;  %v205_v13 = vmul.f32 %v371_v5, %v521_v16  ;;  %v434_v5 = vld [vmem:[#allocation2 + $0x38] sm:$0xff]  }
  0x19   :  { %v372_v14 = vunpack.c.h.bf16 %v423_v56  ;;  %v404_v15 = vunpack.c.h.bf16 %v430_v61  ;;  %315 = vst [vmem:[%s680_s6 + $0x10] sm:$0xff] %v299_v8  ;;  %316 = vst [vmem:[%s680_s6 + $0x18] sm:$0xff] %v300_v9  ;;  %v286_v17 = vadd.f32 %v553_v43, %v264_v10  ;;  %v249_v18 = vmul.f32 %v403_v11, %v540_v23 }
  0x1a   :  { %313 = vst [vmem:[%s680_s6] sm:$0xff] %v297_v2  ;;  %314 = vst [vmem:[%s680_s6 + $0x8] sm:$0xff] %v298_v3  ;;  %v375_v19 = vunpack.c.l.bf16 %v424_v6  ;;  %v407_v20 = vunpack.c.l.bf16 %v431_v7  ;;  %v301_v24 = vmax.f32 %v285_v12, 0.0  ;;  %v227_v25 = vadd.f32 %v535_v22, %v205_v13 }
  0x1b   :  { %v206_v26 = vmul.f32 %v372_v14, %v521_v16  ;;  %v250_v27 = vmul.f32 %v404_v15, %v540_v23  ;;  %v302_v29 = vmax.f32 %v286_v17, 0.0  ;;  %v376_v32 = vunpack.c.h.bf16 %v424_v6 }
  0x1c   :  { %v207_v30 = vmul.f32 %v375_v19, %v521_v16  ;;  %v251_v31 = vmul.f32 %v407_v20, %v540_v23  ;;  %317 = vst [vmem:[%s680_s6 + $0x20] sm:$0xff] %v301_v24  ;;  %v265_v33 = vadd.f32 %v249_v18, %v227_v25  ;;  %v408_v35 = vunpack.c.h.bf16 %v431_v7 }
  0x1d   :  { %v228_v34 = vadd.f32 %v535_v22, %v206_v26  ;;  %v379_v36 = vunpack.c.l.bf16 %v425_v21  ;;  %318 = vst [vmem:[%s680_s6 + $0x28] sm:$0xff] %v302_v29  ;;  %v208_v38 = vmul.f32 %v376_v32, %v521_v16  ;;  %v411_v39 = vunpack.c.l.bf16 %v432_v28 }
  0x1e   :  { %v229_v37 = vadd.f32 %v535_v22, %v207_v30  ;;  %v380_v40 = vunpack.c.h.bf16 %v425_v21  ;;  %v287_v41 = vadd.f32 %v553_v43, %v265_v33  ;;  %v252_v44 = vmul.f32 %v408_v35, %v540_v23 }
  0x1f   :  { %v266_v42 = vadd.f32 %v250_v27, %v228_v34  ;;  %v209_v45 = vmul.f32 %v379_v36, %v521_v16  ;;  %v230_v48 = vadd.f32 %v535_v22, %v208_v38  ;;  %v253_v49 = vmul.f32 %v411_v39, %v540_v23 }
  0x20   :  { %v267_v47 = vadd.f32 %v251_v31, %v229_v37  ;;  %v412_v50 = vunpack.c.h.bf16 %v432_v28  ;;  %v303_v52 = vmax.f32 %v287_v41, 0.0  ;;  %v210_v55 = vmul.f32 %v380_v40, %v521_v16 }
  0x21   :  { %v288_v53 = vadd.f32 %v553_v43, %v266_v42  ;;  %v231_v54 = vadd.f32 %v535_v22, %v209_v45  ;;  %v268_v57 = vadd.f32 %v252_v44, %v230_v48  ;;  %v383_v59 = vunpack.c.l.bf16 %v426_v46 }
  0x22   :  { %v289_v56 = vadd.f32 %v553_v43, %v267_v47  ;;  %v254_v58 = vmul.f32 %v412_v50, %v540_v23  ;;  %319 = vst [vmem:[%s680_s6 + $0x30] sm:$0xff] %v303_v52  ;;  %v232_v62 = vadd.f32 %v535_v22, %v210_v55  ;;  %v415_v63 = vunpack.c.l.bf16 %v433_v51 }
  0x23   :  { %v304_v60 = vmax.f32 %v288_v53, 0.0  ;;  %v269_v61 = vadd.f32 %v253_v49, %v231_v54  ;;  %v290_v2 = vadd.f32 %v553_v43, %v268_v57  ;;  %v211_v3 = vmul.f32 %v383_v59, %v521_v16 }
  0x24   :  { %v305_v1 = vmax.f32 %v289_v56, 0.0  ;;  %v384_v4 = vunpack.c.h.bf16 %v426_v46  ;;  %v270_v7 = vadd.f32 %v254_v58, %v232_v62  ;;  %v255_v8 = vmul.f32 %v415_v63, %v540_v23 }
  0x25   :  { %320 = vst [vmem:[%s680_s6 + $0x38] sm:$0xff] %v304_v60  ;;  %v291_v6 = vadd.f32 %v553_v43, %v269_v61  ;;  %v416_v9 = vunpack.c.h.bf16 %v433_v51  ;;  %v306_v10 = vmax.f32 %v290_v2, 0.0  ;;  %v233_v11 = vadd.f32 %v535_v22, %v211_v3 }
  0x26   :  { %321 = vst [vmem:[%s680_s6 + $0x40] sm:$0xff] %v305_v1  ;;  %v212_v12 = vmul.f32 %v384_v4, %v521_v16  ;;  %v387_v13 = vunpack.c.l.bf16 %v427_v0  ;;  %v292_v15 = vadd.f32 %v553_v43, %v270_v7  ;;  %v419_v18 = vunpack.c.l.bf16 %v434_v5 }
  0x27   :  { %v307_v14 = vmax.f32 %v291_v6, 0.0  ;;  %v256_v17 = vmul.f32 %v416_v9, %v540_v23  ;;  %322 = vst [vmem:[%s680_s6 + $0x48] sm:$0xff] %v306_v10  ;;  %v271_v19 = vadd.f32 %v255_v8, %v233_v11  ;;  %v388_v24 = vunpack.c.h.bf16 %v427_v0 }
  0x28   :  { %v234_v20 = vadd.f32 %v535_v22, %v212_v12  ;;  %v213_v21 = vmul.f32 %v387_v13, %v521_v16  ;;  %v308_v25 = vmax.f32 %v292_v15, 0.0  ;;  %v257_v26 = vmul.f32 %v419_v18, %v540_v23 }
  0x29   :  { %323 = vst [vmem:[%s680_s6 + $0x50] sm:$0xff] %v307_v14  ;;  %v420_v27 = vunpack.c.h.bf16 %v434_v5  ;;  %v293_v28 = vadd.f32 %v553_v43, %v271_v19  ;;  %v214_v31 = vmul.f32 %v388_v24, %v521_v16 }
  0x2a   :  { %v272_v29 = vadd.f32 %v256_v17, %v234_v20  ;;  %v235_v30 = vadd.f32 %v535_v22, %v213_v21  ;;  %324 = vst [vmem:[%s680_s6 + $0x58] sm:$0xff] %v308_v25 }
  0x2b   :  { %v258_v32 = vmul.f32 %v420_v27, %v540_v23  ;;  %v309_v33 = vmax.f32 %v293_v28, 0.0  ;;  %v236_v36 = vadd.f32 %v535_v22, %v214_v31 }
  0x2c   :  { %v294_v34 = vadd.f32 %v553_v43, %v272_v29  ;;  %v273_v35 = vadd.f32 %v257_v26, %v235_v30 }
  0x2d   :  { %325 = vst [vmem:[%s680_s6 + $0x60] sm:$0xff] %v309_v33  ;;  %v274_v16 = vadd.f32 %v258_v32, %v236_v36 }
  0x2e   :  { %v310_v37 = vmax.f32 %v294_v34, 0.0  ;;  %v295_v38 = vadd.f32 %v553_v43, %v273_v35 }
  0x2f   :  { %v296_v23 = vadd.f32 %v553_v43, %v274_v16 }
  0x30   :  { %326 = vst [vmem:[%s680_s6 + $0x68] sm:$0xff] %v310_v37  ;;  %v311_v39 = vmax.f32 %v295_v38, 0.0 }
  0x31   :  { %v312_v22 = vmax.f32 %v296_v23, 0.0 }
  0x32   :  { %327 = vst [vmem:[%s680_s6 + $0x70] sm:$0xff] %v311_v39 }
  0x33   :  { %328 = vst [vmem:[%s680_s6 + $0x78] sm:$0xff] %v312_v22 }

// kernel: res2d_forward.4
= control target key start
LH: loop header
LB: loop body
LE: loop exit
PB: predicated region body
PF: predicated region fallthrough
CT: control target
= control target key end

     0   :  { %s3045_s21 = smov 0   ;;  %s3047_s22 = smov 0   ;;  %s3698_s0 = inlined_call_operand.vmem [shape: bf16[2,8,8,256], index: 0, kind: input, shape index: {}]   ;;  %s3699_s1 = inlined_call_operand.vmem [shape: f32[1,128], index: 1, kind: input, shape index: {}]   ;;  %s3700_s2 = inlined_call_operand.vmem [shape: f32[1,128], index: 2, kind: input, shape index: {}]   ;;  %s3701_s3 = inlined_call_operand.vmem [shape: bf16[9,128,128], index: 3, kind: input, shape index: {}]   ;;  %s3702_s4 = inlined_call_operand.vmem [shape: f32[1,128], index: 4, kind: input, shape index: {}]   ;;  %s3703_s5 = inlined_call_operand.vmem [shape: bf16[2,8,8,128], index: 5, kind: output, shape index: {0}]   ;;  %s3704_s6 = inlined_call_operand.vmem [shape: f32[2,2,128], index: 6, kind: output, shape index: {1}]  }
   0x1   :  { %s3049_s23 = smov 0  }
   0x2 LB: > { %s2161_s24 = sadd.s32 4294967295, %s3007_s23   ;;  %s3062_s25 = sadd.s32 1, %s3007_s23   ;;  %s3007_s23 = sphi %s3049_s23, %s3715_s23   ;;  %s3003_s22 = sphi %s3047_s22, %s3714_s22   ;;  %s2999_s21 = sphi %s3045_s21, %s3713_s21  }
   0x3   : > { %s21_s26 = ssub.s32 %s3007_s23, %s3062_s25  ;;  %s24_s27 = sadd.s32 1, %s3003_s22 }
   0x4   : > { %p22_p0 = scmp.eq.s32.totalorder %s21_s26, 0  ;;  %p31_p1 = scmp.ne.s32.totalorder %s3003_s22, %s2999_s21 }
   0x5   : > { %p32_p2 = scmp.eq.s32.totalorder %s3007_s23, 0  ;;  %p2164_p4 = scmp.ge.s32.totalorder %s3007_s23, 2 }
   0x6   : > { %s3071_s28 = scalar_select %p22_p0, %s3003_s22, %s24_s27  }
   0x7   : > { %p33_p3 = por %p32_p2, %p31_p1  ;;  %205 = sbr.rel (%p2164_p4) target bundleno = 23 (0x17), region = 32 }
   0xe   : > { %208 = sbr.rel (!%p33_p3) target bundleno = 23 (0x17), region = 36  ;;  %s210_s29 = sand.u32 (%p33_p3), 1, %s3003_s22  }
   0xf   : > { %s2432_s30 = sshll.u32 (%p33_p3), %s3007_s23, 6  ;;  %s2165_s7 = sshll.u32 (%p33_p3), %s210_s29, 5 }
  0x10   : > { %s215_s10 = scalar_lea.vmem (%p33_p3), %s3698_s0, %s2432_s30  ;;  %s212_s11 = scalar_lea.vmem (%p33_p3), [#allocation2], %s2165_s7 }
  0x11   : > { %v231_v0 = vld [vmem:[%s215_s10] sm:$0xf] (%p33_p3)  ;;  %v233_v1 = vld [vmem:[%s215_s10 + $0x8] sm:$0xf] (%p33_p3)  ;;  %v235_v2 = vld [vmem:[%s215_s10 + $0x10] sm:$0xf] (%p33_p3) }
  0x12   : > { %232 = vst [vmem:[%s212_s11] sm:$0xf] (%p33_p3), %v231_v0  ;;  %234 = vst [vmem:[%s212_s11 + $0x4] sm:$0xf] (%p33_p3), %v233_v1  ;;  %v237_v3 = vld [vmem:[%s215_s10 + $0x18] sm:$0xf] (%p33_p3) }
  0x13   : > { %v239_v4 = vld [vmem:[%s215_s10 + $0x20] sm:$0xf] (%p33_p3)  ;;  %236 = vst [vmem:[%s212_s11 + $0x8] sm:$0xf] (%p33_p3), %v235_v2  ;;  %238 = vst [vmem:[%s212_s11 + $0xc] sm:$0xf] (%p33_p3), %v237_v3 }
  0x14   : > { %240 = vst [vmem:[%s212_s11 + $0x10] sm:$0xf] (%p33_p3), %v239_v4  ;;  %v241_v5 = vld [vmem:[%s215_s10 + $0x28] sm:$0xf] (%p33_p3)  ;;  %v243_v6 = vld [vmem:[%s215_s10 + $0x30] sm:$0xf] (%p33_p3) }
  0x15   : > { %v245_v7 = vld [vmem:[%s215_s10 + $0x38] sm:$0xf]  ;;  %242 = vst [vmem:[%s212_s11 + $0x14] sm:$0xf] %v241_v5  ;;  %244 = vst [vmem:[%s212_s11 + $0x18] sm:$0xf] %v243_v6 }
  0x16   : > { %246 = vst [vmem:[%s212_s11 + $0x1c] sm:$0xf] %v245_v7 }
  0x17 PF: > { %p2168_p5 = scmp.ge.s32.totalorder %s3007_s23, 1  ;;  %p284_p6 = scmp.lt.s32.totalorder %s3007_s23, 3 }
  0x19   : > { %p285_p7 = pnand %p2168_p5, %p284_p6 }
  0x1a   : > { %v2913_v8 = vld [vmem:[%s3701_s3] sm:$0xff] (!%p285_p7)   ;;  %v2915_v10 = vld [vmem:[%s3701_s3 + $0x8] sm:$0xff] (!%p285_p7)   ;;  %v2917_v12 = vld [vmem:[%s3701_s3 + $0x10] sm:$0xff] (!%p285_p7)   ;;  %s291_s30 = sand.u32 (!%p285_p7), 1, %s2999_s21   ;;  %vm460_vm0 = vcmask (!%p285_p7), 1040384   ;;  %v3009_v40 = vmov (!%p285_p7), 0  }
  0x1b   : > { %288 = sbr.rel (%p285_p7) target bundleno = 445 (0x1bd), region = 77  ;;  %v2914_v9 = vld [vmem:[%s3701_s3 + $0x100] sm:$0xff] (!%p285_p7)   ;;  %2584 = vmatprep.subr.bf16.mxu1 (!%p285_p7), %v2913_v8  ;;  %v2916_v11 = vld [vmem:[%s3701_s3 + $0x108] sm:$0xff] (!%p285_p7)   ;;  %v2918_v13 = vld [vmem:[%s3701_s3 + $0x110] sm:$0xff] (!%p285_p7)   ;;  %s2169_s11 = sshll.u32 (!%p285_p7), %s291_s30, 5  ;;  %v3152_v41 = vcombine.low (!%p285_p7), %v3009_v40, %v3009_v40  ;;  %vm471_vm3 = vcmask (!%p285_p7), 1044480  }
  0x1c   : > { %2680 = vmatprep.subr.bf16.mxu0 (!%p285_p7), %v2914_v9  ;;  %2585 = vmatpush3.bf16.msra.mxu1 (!%p285_p7), %v2913_v8  ;;  %v2919_v14 = vld [vmem:[%s3701_s3 + $0x18] sm:$0xff] (!%p285_p7)   ;;  %v2921_v16 = vld [vmem:[%s3701_s3 + $0x20] sm:$0xff] (!%p285_p7)   ;;  %v2923_v18 = vld [vmem:[%s3701_s3 + $0x28] sm:$0xff] (!%p285_p7)   ;;  %s3115_s17 = scalar_lea.vmem (!%p285_p7), [#allocation2], %s2169_s11  ;;  %vm461_vm1 = vsmask.f32 (!%p285_p7), 256 }
  0x1d   : > { %2681 = vmatpush3.bf16.msra.mxu0 (!%p285_p7), %v2914_v9  ;;  %2586 = vmatprep.subr.bf16.mxu1 (!%p285_p7), %v2915_v10  ;;  %v2920_v15 = vld [vmem:[%s3701_s3 + $0x118] sm:$0xff] (!%p285_p7)   ;;  %v2922_v17 = vld [vmem:[%s3701_s3 + $0x120] sm:$0xff] (!%p285_p7)   ;;  %v2924_v21 = vld [vmem:[%s3701_s3 + $0x128] sm:$0xff] (!%p285_p7)   ;;  %vm472_vm2 = vsmask.f32 (!%p285_p7), 4352  ;;  %v679_v54 = vshrl.u32 (!%p285_p7), %v3152_v41, 16 }
  0x1e   : > { %2682 = vmatprep.subr.bf16.mxu0 (!%p285_p7), %v2916_v11  ;;  %v2435_v19 = vld [vmem:[%s3115_s17] sm:$0xff] (!%p285_p7)   ;;  %v2470_v27 = vld [vmem:[%s3115_s17 + $0x8] sm:$0xff] (!%p285_p7)   ;;  %v2925_v28 = vld [vmem:[%s3701_s3 + $0x30] sm:$0xff] (!%p285_p7)   ;;  %vm675_vm6 = vsmask.f32 (!%p285_p7), 3328  ;;  %v682_v4 = vshll.u32 (!%p285_p7), %v3152_v41, 16 }
  0x1f   : > { %v3121_v20 = vld [vmem:[%s3699_s1] ss:$0 sm:$0xff] (!%p285_p7)  ;;  %v2436_v22 = vunpack.c.l.bf16 (!%p285_p7), %v2435_v19  ;;  %v2437_v23 = vunpack.c.h.bf16 (!%p285_p7), %v2435_v19  ;;  %v2440_v29 = vunpack.c.l.bf16 (!%p285_p7), %v2470_v27  ;;  %v2441_v30 = vunpack.c.h.bf16 (!%p285_p7), %v2470_v27  ;;  %v2926_v31 = vld [vmem:[%s3701_s3 + $0x130] sm:$0xff] (!%p285_p7)   ;;  %v2927_v34 = vld [vmem:[%s3701_s3 + $0x38] sm:$0xff] (!%p285_p7)   ;;  %p324_p8 = scmp.lt.s32.totalorder (!%p285_p7), %s2161_s24, 1 }
  0x20   : > { %2587 = vmatpush3.bf16.msra.mxu1 (!%p285_p7), %v2915_v10  ;;  %v3129_v24 = vld [vmem:[%s3700_s2] ss:$0 sm:$0xff] (!%p285_p7)  ;;  %v2928_v37 = vld [vmem:[%s3701_s3 + $0x138] sm:$0xff] (!%p285_p7)   ;;  %vm3169_vm4 = vmand (!%p285_p7), %vm460_vm0, %vm461_vm1  ;;  %vm676_vm7 = vsmask.f32 (!%p285_p7), 7440  ;;  %vm944_vm9 = vcmask (!%p285_p7), 1042432  }
  0x21   : > { %2683 = vmatpush3.bf16.msra.mxu0 (!%p285_p7), %v2916_v11  ;;  %2588 = vmatprep.subr.bf16.mxu1 (!%p285_p7), %v2917_v12  ;;  %v357_v25 = vmul.f32 (!%p285_p7), %v2436_v22, %v3121_v20  ;;  %v358_v26 = vmul.f32 (!%p285_p7), %v2437_v23, %v3121_v20  ;;  %v359_v35 = vmul.f32 (!%p285_p7), %v2440_v29, %v3121_v20  ;;  %v3159_v46 = vld [vmem:[%s3701_s3 + $0x40] sm:$0xff] (!%p285_p7)   ;;  %vm3175_vm5 = vmand (!%p285_p7), %vm471_vm3, %vm472_vm2  ;;  %v2471_v6 = vld [vmem:[%s3115_s17 + $0x10] sm:$0xff] (!%p285_p7)   ;;  %vm945_vm10 = vcmask (!%p285_p7), 1046532  }
  0x22   : > { %2684 = vmatprep.subr.bf16.mxu0 %v2918_v13  ;;  %v360_v36 = vmul.f32 %v2441_v30, %v3121_v20  ;;  %v3165_v55 = vld [vmem:[%s3701_s3 + $0x140] sm:$0xff]   ;;  %v2444_v9 = vunpack.c.l.bf16 %v2471_v6  ;;  %v2445_v10 = vunpack.c.h.bf16 %v2471_v6  ;;  %vm3248_vm8 = vmor %vm675_vm6, %vm676_vm7  ;;  %s3717_s24 = smov (!%p324_p8, %s2161_s24), 1 }
  0x23   : > { %v372_v32 = vadd.f32 %v3129_v24, %v357_v25  ;;  %v373_v33 = vadd.f32 %v3129_v24, %v358_v26  ;;  %v374_v42 = vadd.f32 %v3129_v24, %v359_v35  ;;  %vm3436_vm11 = vmor %vm944_vm9, %vm945_vm10  ;;  %s2433_s21 = sshll.u32 %s3717_s24, 5  ;;  %s2172_s23 = sshll.u32 %s3717_s24, 1 }
  0x24   : > { %2589 = vmatpush3.bf16.msra.mxu1 %v2917_v12  ;;  %v375_v43 = vadd.f32 %v3129_v24, %v360_v36  ;;  %v361_v23 = vmul.f32 %v2444_v9, %v3121_v20  ;;  %s328_s16 = scalar_lea.vmem %s3703_s5, %s2433_s21  ;;  %s332_s20 = scalar_lea.vmem %s3704_s6, %s2172_s23 }
  0x25   : > { %2685 = vmatpush3.bf16.msra.mxu0 %v2918_v13  ;;  %2590 = vmatprep.subr.bf16.mxu1 %v2919_v14  ;;  %v380_v38 = vmax.f32 %v372_v32, 0.0  ;;  %v381_v39 = vmax.f32 %v373_v33, 0.0  ;;  %v382_v47 = vmax.f32 %v374_v42, 0.0 }
  0x26   : > { %2686 = vmatprep.subr.bf16.mxu0 %v2920_v15  ;;  %v383_v48 = vmax.f32 %v375_v43, 0.0  ;;  %v2931_v43 = vld [vmem:[%s3701_s3 + $0x48] sm:$0xff]  }
  0x27   : > { %v388_v44 = vpack.c.bf16 %v380_v38, %v380_v38  ;;  %v389_v45 = vpack.c.bf16 %v381_v39, %v381_v39  ;;  %v390_v53 = vpack.c.bf16 %v382_v47, %v382_v47 }
  0x28   : > { %2591 = vmatpush3.bf16.msra.mxu1 %v2919_v14  ;;  %v391_v56 = vpack.c.bf16 %v383_v48, %v383_v48 }
  0x29   : > { %2687 = vmatpush3.bf16.msra.mxu0 %v2920_v15  ;;  %2592 = vmatprep.subr.bf16.mxu1 %v2921_v16  ;;  %v397_v49 = vshrl.u32 %v388_v44, 16  ;;  %v400_v50 = vshll.u32 %v388_v44, 16  ;;  %v404_v51 = vshrl.u32 %v389_v45, 16  ;;  %v407_v52 = vshll.u32 %v389_v45, 16 }
  0x2a   : > { %2688 = vmatprep.subr.bf16.mxu0 %v2922_v17  ;;  %v411_v61 = vshrl.u32 %v390_v53, 16  ;;  %v414_v62 = vshll.u32 %v390_v53, 16  ;;  %v418_v63 = vshrl.u32 %v391_v56, 16  ;;  %v421_v0 = vshll.u32 %v391_v56, 16 }
  0x2b   : > { %v399_v57 = vrot.slane %v397_v49, 7  ;;  %v406_v59 = vrot.slane %v404_v51, 7  ;;  %v681_v56 = vrot.slane %v679_v54, 4  ;;  %v2933_v54 = vld [vmem:[%s3701_s3 + $0x50] sm:$0xff]  }
  0x2c   : > { %2593 = vmatpush3.bf16.msra.mxu1 %v2921_v16  ;;  %v413_v3 = vrot.slane %v411_v61, 7  ;;  %v420_v5 = vrot.slane %v418_v63, 7 }
  0x2d   : > { %2689 = vmatpush3.bf16.msra.mxu0 %v2922_v17  ;;  %2594 = vmatprep.subr.bf16.mxu1 %v2923_v18  ;;  %v402_v1 = vor.u32 %v400_v50, %v399_v57  ;;  %v409_v2 = vor.u32 %v407_v52, %v406_v59 }
  0x2e   : > { %2690 = vmatprep.subr.bf16.mxu0 %v2924_v21  ;;  %v416_v12 = vor.u32 %v414_v62, %v413_v3  ;;  %v423_v14 = vor.u32 %v421_v0, %v420_v5  ;;  %v362_v0 = vmul.f32 %v2445_v10, %v3121_v20 }
  0x2f   : > { %v463_v7 = vsel %vm3169_vm4, 0, %v402_v1  ;;  %v464_v8 = vsel %vm3169_vm4, 0, %v409_v2  ;;  %v376_v1 = vadd.f32 %v3129_v24, %v361_v23 }
  0x30   : > { %2595 = vmatpush3.bf16.msra.mxu1 %v2923_v18  ;;  %v3189_v11 = vsel %vm3175_vm5, %v463_v7, 0  ;;  %v3193_v13 = vsel %vm3175_vm5, %v464_v8, 0  ;;  %v465_v19 = vsel %vm3169_vm4, 0, %v416_v12  ;;  %v466_v22 = vsel %vm3169_vm4, 0, %v423_v14 }
  0x31   : > { %2691 = vmatpush3.bf16.msra.mxu0 %v2924_v21  ;;  %2596 = vmatprep.subr.bf16.mxu1 %v2925_v28  ;;  %v2176_v15 = vcombine.low %v3009_v40, %v3189_v11  ;;  %v3199_v16 = vcombine.low %v3189_v11, %v3189_v11  ;;  %v3203_v17 = vcombine.high %v3189_v11, %v3189_v11  ;;  %v3220_v25 = vsel %vm3175_vm5, %v465_v19, 0 }
  0x32   : > { %2692 = vmatprep.subr.bf16.mxu0 %v2926_v31  ;;  %v3207_v18 = vcombine.low %v3193_v13, %v3193_v13  ;;  %v3213_v21 = vcombine.high %v3193_v13, %v3193_v13  ;;  %v3227_v29 = vcombine.low %v3220_v25, %v3220_v25  ;;  %v3231_v30 = vcombine.high %v3220_v25, %v3220_v25 }
  0x33   : > { %2600 = vmatprep.mubr.bf16.mxu1 %v2176_v15  ;;  %v693_v26 = vshrl.u32 %v3199_v16, 16  ;;  %v696_v27 = vshll.u32 %v3199_v16, 16  ;;  %v3244_v48 = vcombine.low %v3193_v13, %v3220_v25  ;;  %v3254_v53 = vsel %vm3175_vm5, %v466_v22, 0 }
  0x34   : > { %2597 = vmatpush3.bf16.msra.mxu1 %v2925_v28  ;;  %v702_v28 = vshll.u32 %v3203_v17, 16  ;;  %v710_v32 = vshll.u32 %v3207_v18, 16  ;;  %v716_v36 = vshll.u32 %v3213_v21, 16  ;;  %v721_v39 = vshrl.u32 %v3227_v29, 16 }
  0x35   : > { %2693 = vmatpush3.bf16.msra.mxu0 %v2926_v31  ;;  %2598 = vmatprep.subr.bf16.mxu1 %v2927_v34  ;;  %v707_v31 = vshrl.u32 %v3207_v18, 16  ;;  %v695_v33 = vrot.slane %v693_v26, 4  ;;  %v724_v42 = vshll.u32 %v3227_v29, 16  ;;  %v730_v47 = vshll.u32 %v3231_v30, 16 }
  0x36   : > { %2694 = vmatprep.subr.bf16.mxu0 %v2928_v37  ;;  %v704_v35 = vrot.slane %v702_v28, 5  ;;  %v712_v38 = vrot.slane %v710_v32, 5  ;;  %v718_v45 = vrot.slane %v716_v36, 5  ;;  %v723_v51 = vrot.slane %v721_v39, 4  ;;  %v2935_v32 = vld [vmem:[%s3701_s3 + $0x58] sm:$0xff]  }
  0x37   : > { %v726_v52 = vrot.slane %v724_v42, 5  ;;  %v3261_v59 = vcombine.low %v3254_v53, %v3254_v53  ;;  %v3265_v61 = vcombine.high %v3254_v53, %v3254_v53  ;;  %v3283_v7 = vcombine.high %v3009_v40, %v3009_v40 }
  0x38   : > { %2599 = vmatpush3.bf16.msra.mxu1 %v2927_v34  ;;  %v698_v34 = vrot.slane %v696_v27, 5  ;;  %v732_v9 = vrot.slane %v730_v47, 5  ;;  %v384_v10 = vmax.f32 %v376_v1, 0.0  ;;  %v684_v22 = vrot.slane %v682_v4, 5 }
  0x39   : > { %2695 = vmatpush3.bf16.msra.mxu0 %v2928_v37  ;;  %2608 = vmatprep.subr.bf16.mxu1 %v3159_v46  ;;  %v709_v37 = vrot.slane %v707_v31, 4  ;;  %v727_v63 = vor.u32 %v726_v52, %v723_v51  ;;  %v735_v3 = vshrl.u32 %v3261_v59, 16  ;;  %v738_v5 = vshll.u32 %v3261_v59, 16  ;;  %v2937_v51 = vld [vmem:[%s3701_s3 + $0x60] sm:$0xff]  }
  0x3a   : > { %2704 = vmatprep.subr.bf16.mxu0 %v3165_v55  ;;  %v699_v44 = vor.u32 %v698_v34, %v695_v33  ;;  %v744_v6 = vshll.u32 %v3265_v61, 16  ;;  %v392_v23 = vpack.c.bf16 %v384_v10, %v384_v10  ;;  %v377_v26 = vadd.f32 %v3129_v24, %v362_v0 }
  0x3b   : > { %v713_v50 = vor.u32 %v712_v38, %v709_v37  ;;  %2601 = vmatmul.mubr.bf16.vlgmr.msra.gmra.mrb[0].mxu1 %v3244_v48  ;;  %v728_v12 = vrot.slane %v727_v63, 4  ;;  %v737_v15 = vrot.slane %v735_v3, 4  ;;  %v740_v19 = vrot.slane %v738_v5, 5  ;;  %v2934_v5 = vld [vmem:[%s3701_s3 + $0x150] sm:$0xff]  }
  0x3c   : > { %v700_v57 = vrot.slane %v699_v44, 4  ;;  %2609 = vmatpush3.bf16.msra.mxu1 %v3159_v46  ;;  %v2472_v46 = vld [vmem:[%s3115_s17 + $0x18] sm:$0xff]   ;;  %v746_v31 = vrot.slane %v744_v6, 5  ;;  %v425_v34 = vshrl.u32 %v392_v23, 16  ;;  %v385_v36 = vmax.f32 %v377_v26, 0.0 }
  0x3d   : > { %v714_v62 = vrot.slane %v713_v50, 4  ;;  %2610 = vmatprep.subr.bf16.mxu1 %v2931_v43  ;;  %v2448_v27 = vunpack.c.l.bf16 %v2472_v46  ;;  %v741_v28 = vor.u32 %v740_v19, %v737_v15  ;;  %v2449_v33 = vunpack.c.h.bf16 %v2472_v46  ;;  %v2939_v46 = vld [vmem:[%s3701_s3 + $0x68] sm:$0xff]  }
  0x3e   : > { %v3275_v2 = vsel %vm3248_vm8, %v700_v57, %v704_v35  ;;  %v428_v35 = vshll.u32 %v392_v23, 16  ;;  %v688_v4 = vshll.u32 %v3283_v7, 16  ;;  %v3301_v38 = vsel %vm3248_vm8, %v728_v12, %v732_v9 }
  0x3f   : > { %v3287_v8 = vsel %vm3248_vm8, %v714_v62, %v718_v45  ;;  %v363_v37 = vmul.f32 %v2448_v27, %v3121_v20  ;;  %v742_v39 = vrot.slane %v741_v28, 4  ;;  %v364_v42 = vmul.f32 %v2449_v33, %v3121_v20 }
  0x40   : > { %v2314_v14 = vcombine.low %v3275_v2, %v3287_v8  ;;  %2611 = vmatpush3.bf16.msra.mxu1 %v2931_v43  ;;  %v685_v43 = vor.u32 %v684_v22, %v681_v56  ;;  %v427_v44 = vrot.slane %v425_v34, 7  ;;  %v393_v45 = vpack.c.bf16 %v385_v36, %v385_v36  ;;  %v2932_v56 = vld [vmem:[%s3701_s3 + $0x148] sm:$0xff]  }
  0x41   : > { %2612 = vmatprep.subr.bf16.mxu1 %v2933_v54  ;;  %v378_v47 = vadd.f32 %v3129_v24, %v363_v37  ;;  %v3307_v50 = vsel %vm3248_vm8, %v742_v39, %v746_v31  ;;  %v379_v52 = vadd.f32 %v3129_v24, %v364_v42  ;;  %v2936_v31 = vld [vmem:[%s3701_s3 + $0x158] sm:$0xff]   ;;  %v2285_v49 = vcombine.low %v3220_v25, %v3254_v53 }
  0x42   : > { %2696 = vmatprep.mubr.bf16.mxu0 %v2314_v14  ;;  %v2315_v20 = vcombine.low %v3301_v38, %v3307_v50  ;;  %v430_v57 = vor.u32 %v428_v35, %v427_v44  ;;  %v432_v62 = vshrl.u32 %v393_v45, 16  ;;  %v435_v63 = vshll.u32 %v393_v45, 16  ;;  %v2980_v25 = vld [vmem:[%s3701_s3 + $0x218] sm:$0xff]  }
  0x43   : > { %v386_v0 = vmax.f32 %v378_v47, 0.0  ;;  %v387_v1 = vmax.f32 %v379_v52, 0.0  ;;  %v686_v3 = vrot.slane %v685_v43, 4  ;;  %v2232_v52 = vrot.slane %v3152_v41, 9 }
  0x44   : > { %2613 = vmatpush3.bf16.msra.mxu1 %v2933_v54  ;;  %v690_v54 = vrot.slane %v688_v4, 5  ;;  %2697 = vmatmul.mubr.bf16.vlgmr.msra.gmra.mrb[0].mxu0 %v2315_v20  ;;  %v467_v24 = vsel %vm3169_vm4, 0, %v430_v57  ;;  %v434_v6 = vrot.slane %v432_v62, 7  ;;  %v949_v20 = vrot.slane %v3283_v7, 5 }
  0x45   : > { %2614 = vmatprep.subr.bf16.mxu1 %v2935_v32  ;;  %2705 = vmatpush3.bf16.msra.mxu0 %v3165_v55  ;;  %v3329_v9 = vsel %vm3175_vm5, %v467_v24, 0  ;;  %v394_v10 = vpack.c.bf16 %v386_v0, %v386_v0  ;;  %v395_v12 = vpack.c.bf16 %v387_v1, %v387_v1  ;;  %v2943_v0 = vld [vmem:[%s3701_s3 + $0x78] sm:$0xff]  }
  0x46   : > { %2706 = vmatprep.subr.bf16.mxu0 %v2932_v56  ;;  %v3333_v14 = vcombine.low %v3254_v53, %v3329_v9  ;;  %v3337_v15 = vcombine.low %v3329_v9, %v3329_v9  ;;  %v437_v55 = vor.u32 %v435_v63, %v434_v6  ;;  %v3341_v19 = vcombine.high %v3329_v9, %v3329_v9  ;;  %v2981_v53 = vld [vmem:[%s3701_s3 + $0x220] sm:$0xff]  }
  0x47   : > { %v439_v22 = vshrl.u32 %v394_v10, 16  ;;  %v442_v23 = vshll.u32 %v394_v10, 16  ;;  %v446_v26 = vshrl.u32 %v395_v12, 16  ;;  %v449_v27 = vshll.u32 %v395_v12, 16 }
  0x48   : > { %2615 = vmatpush3.bf16.msra.mxu1 %v2935_v32  ;;  %v3345_v28 = vsel %vm3248_vm8, %v686_v3, %v690_v54  ;;  %2604 = vmatprep.mubr.bf16.mxu1 %v3333_v14  ;;  %v2941_v32 = vld [vmem:[%s3701_s3 + $0x70] sm:$0xff]   ;;  %v468_v33 = vsel %vm3169_vm4, 0, %v437_v55  ;;  %v749_v34 = vshrl.u32 %v3337_v15, 16  ;;  %v752_v35 = vshll.u32 %v3337_v15, 16 }
  0x49   : > { %2616 = vmatprep.subr.bf16.mxu1 %v2937_v51  ;;  %2707 = vmatpush3.bf16.msra.mxu0 %v2932_v56  ;;  %v3360_v36 = vsel %vm3175_vm5, %v468_v33, 0  ;;  %v758_v37 = vshll.u32 %v3341_v19, 16  ;;  %v441_v4 = vrot.slane %v439_v22, 7  ;;  %v448_v39 = vrot.slane %v446_v26, 7  ;;  %v2938_v56 = vld [vmem:[%s3701_s3 + $0x160] sm:$0xff]  }
  0x4a   : > { %2708 = vmatprep.subr.bf16.mxu0 %v2934_v5  ;;  %v3365_v42 = vcombine.low %v3360_v36, %v3360_v36  ;;  %v3369_v43 = vcombine.high %v3360_v36, %v3360_v36  ;;  %v751_v44 = vrot.slane %v749_v34, 4  ;;  %v754_v45 = vrot.slane %v752_v35, 5 }
  0x4b   : > { %v444_v47 = vor.u32 %v442_v23, %v441_v4  ;;  %v2220_v1 = vcombine.low %v3345_v28, %v3275_v2  ;;  %v3386_v3 = vcombine.low %v3287_v8, %v3301_v38  ;;  %v760_v10 = vrot.slane %v758_v37, 5 }
  0x4c   : > { %2617 = vmatpush3.bf16.msra.mxu1 %v2937_v51  ;;  %v451_v51 = vor.u32 %v449_v27, %v448_v39  ;;  %v755_v57 = vor.u32 %v754_v45, %v751_v44  ;;  %v763_v62 = vshrl.u32 %v3365_v42, 16  ;;  %v766_v63 = vshll.u32 %v3365_v42, 16  ;;  %v2945_v27 = vld [vmem:[%s3701_s3 + $0x80] sm:$0xff]  }
  0x4d   : > { %2618 = vmatprep.subr.bf16.mxu1 %v2939_v46  ;;  %v772_v54 = vshll.u32 %v3369_v43, 16  ;;  %2709 = vmatpush3.bf16.msra.mxu0 %v2934_v5  ;;  %v469_v24 = vsel %vm3169_vm4, 0, %v444_v47  ;;  %v2233_v38 = vrot.slane %v3199_v16, 9  ;;  %v953_v5 = vrot.slane %v3203_v17, 5 }
  0x4e   : > { %v470_v6 = vsel %vm3169_vm4, 0, %v451_v51  ;;  %2710 = vmatprep.subr.bf16.mxu0 %v2936_v31  ;;  %v765_v12 = vrot.slane %v763_v62, 4  ;;  %v768_v55 = vrot.slane %v766_v63, 5  ;;  %v3394_v2 = vsel %vm3175_vm5, %v469_v24, 0  ;;  %v2952_v24 = vld [vmem:[%s3701_s3 + $0x198] sm:$0xff]  }
  0x4f   : > { %v3398_v8 = vsel %vm3175_vm5, %v470_v6, 0  ;;  %v774_v58 = vrot.slane %v772_v54, 5  ;;  %v3404_v23 = vcombine.low %v3360_v36, %v3394_v2  ;;  %v3408_v26 = vcombine.low %v3394_v2, %v3394_v2 }
  0x50   : > { %2619 = vmatpush3.bf16.msra.mxu1 %v2939_v46  ;;  %v756_v46 = vrot.slane %v755_v57, 4  ;;  %v769_v22 = vor.u32 %v768_v55, %v765_v12  ;;  %v3412_v60 = vcombine.high %v3394_v2, %v3394_v2  ;;  %v2296_v16 = vcombine.low %v3398_v8, %v3398_v8  ;;  %v2947_v55 = vld [vmem:[%s3701_s3 + $0x88] sm:$0xff]  }
  0x51   : > { %2620 = vmatprep.subr.bf16.mxu1 %v2941_v32  ;;  %2711 = vmatpush3.bf16.msra.mxu0 %v2936_v31  ;;  %v2297_v17 = vcombine.high %v3398_v8, %v3398_v8  ;;  %v2234_v33 = vrot.slane %v3207_v18, 9  ;;  %v2940_v31 = vld [vmem:[%s3701_s3 + $0x168] sm:$0xff]   ;;  %v777_v35 = vshrl.u32 %v3408_v26, 16  ;;  %v780_v37 = vshll.u32 %v3408_v26, 16 }
  0x52   : > { %2712 = vmatprep.subr.bf16.mxu0 %v2938_v56  ;;  %v770_v34 = vrot.slane %v769_v22, 4  ;;  %2605 = vmatmul.mubr.bf16.gmra.mrb[4].mxu1 %v3404_v23  ;;  %v786_v4 = vshll.u32 %v3412_v60, 16  ;;  %v1285_v39 = vshrl.u32 %v2296_v16, 16  ;;  %v1288_v44 = vshll.u32 %v2296_v16, 16 }
  0x53   : > { %v1294_v18 = vshll.u32 %v2297_v17, 16  ;;  %2624 = vmatprep.mubr.bf16.mxu1 %v2220_v1  ;;  %v779_v47 = vrot.slane %v777_v35, 4  ;;  %v782_v51 = vrot.slane %v780_v37, 5  ;;  %v957_v57 = vrot.slane %v3213_v21, 5 }
  0x54   : > { %2621 = vmatpush3.bf16.msra.mxu1 %v2941_v32  ;;  %v761_v32 = vsel %vm3248_vm8, %v756_v46, %v760_v10  ;;  %v775_v45 = vsel %vm3248_vm8, %v770_v34, %v774_v58  ;;  %v1287_v63 = vrot.slane %v1285_v39, 4  ;;  %v1290_v54 = vrot.slane %v1288_v44, 5  ;;  %v2944_v34 = vld [vmem:[%s3701_s3 + $0x178] sm:$0xff]  }
  0x55   : > { %2622 = vmatprep.subr.bf16.mxu1 %v2943_v0  ;;  %2713 = vmatpush3.bf16.msra.mxu0 %v2938_v56  ;;  %v2316_v62 = vcombine.low %v761_v32, %v775_v45  ;;  %v2235_v1 = vrot.slane %v3227_v29, 9  ;;  %v783_v6 = vor.u32 %v782_v51, %v779_v47  ;;  %v788_v21 = vrot.slane %v786_v4, 5 }
  0x56   : > { %2714 = vmatprep.subr.bf16.mxu0 %v2940_v31  ;;  %v961_v56 = vrot.slane %v3231_v30, 5  ;;  %v3446_v46 = vcombine.low %v3307_v50, %v761_v32  ;;  %v1291_v10 = vor.u32 %v1290_v54, %v1287_v63  ;;  %v1296_v12 = vrot.slane %v1294_v18, 5 }
  0x57   : > { %2700 = vmatprep.mubr.bf16.mxu0 %v2316_v62  ;;  %v2326_v29 = vrot.slane %v2296_v16, 9  ;;  %v1447_v22 = vrot.slane %v2297_v17, 5  ;;  %v784_v58 = vrot.slane %v783_v6, 4  ;;  %v954_v30 = vsel %vm3436_vm11, %v2233_v38, %v953_v5 }
  0x58   : > { %2623 = vmatpush3.bf16.msra.mxu1 %v2943_v0  ;;  %v2942_v0 = vld [vmem:[%s3701_s3 + $0x170] sm:$0xff]   ;;  %v3458_v50 = vsel %vm3436_vm11, %v2234_v33, %v957_v57  ;;  %v2236_v32 = vrot.slane %v3261_v59, 9  ;;  %v1292_v35 = vrot.slane %v1291_v10, 4  ;;  %v965_v37 = vrot.slane %v3265_v61, 5  ;;  %v2951_v57 = vld [vmem:[%s3701_s3 + $0x98] sm:$0xff]   ;;  %v2954_v10 = vld [vmem:[%s3701_s3 + $0x1a0] sm:$0xff]  }
  0x59   : > { %2632 = vmatprep.subr.bf16.mxu1 %v2945_v27  ;;  %2715 = vmatpush3.bf16.msra.mxu0 %v2940_v31  ;;  %v3464_v16 = vsel %vm3436_vm11, %v2326_v29, %v1447_v22  ;;  %v3472_v38 = vsel %vm3436_vm11, %v2232_v52, %v949_v20  ;;  %v789_v59 = vsel %vm3248_vm8, %v784_v58, %v788_v21  ;;  %v2949_v52 = vld [vmem:[%s3701_s3 + $0x90] sm:$0xff]   ;;  %v2237_v20 = vrot.slane %v3337_v15, 9  ;;  %v2961_v29 = vld [vmem:[%s3701_s3 + $0xc0] sm:$0xff]   ;;  %v2963_v58 = vld [vmem:[%s3701_s3 + $0xc8] sm:$0xff]  }
  0x5a   : > { %2716 = vmatprep.subr.bf16.mxu0 %v2942_v0  ;;  %v2421_v61 = vcombine.low %v3464_v16, %v3472_v38  ;;  %v3481_v5 = vsel %vm3248_vm8, %v1292_v35, %v1296_v12  ;;  %v2343_v7 = vcombine.low %v954_v30, %v3458_v50  ;;  %v2284_v17 = vcombine.low %v3189_v11, %v3193_v13  ;;  %v2959_v12 = vld [vmem:[%s3701_s3 + $0xb8] sm:$0xff]   ;;  %v2962_v35 = vld [vmem:[%s3701_s3 + $0x1c0] sm:$0xff]  }
  0x5b   : > { %2625 = vmatmul.mubr.bf16.vlgmr.msra.gmra.mrb[0].mxu1 %v3386_v3  ;;  %v2317_v41 = vcombine.low %v789_v59, %v3481_v5  ;;  %v969_v33 = vrot.slane %v3341_v19, 5  ;;  %v2286_v31 = vcombine.low %v3329_v9, %v3360_v36  ;;  %v2287_v4 = vcombine.low %v3394_v2, %v3398_v8  ;;  %v2968_v13 = vld [vmem:[%s3701_s3 + $0x1d8] sm:$0xff]   ;;  %v2982_v9 = vld [vmem:[%s3701_s3 + $0x228] sm:$0xff]   ;;  %v2983_v36 = vld [vmem:[%s3701_s3 + $0x230] sm:$0xff]  }
  0x5c   : > { %2633 = vmatpush3.bf16.msra.mxu1 %v2945_v27  ;;  %2628 = vmatprep.mubr.bf16.mxu1 %v3446_v46  ;;  %v2946_v27 = vld [vmem:[%s3701_s3 + $0x180] sm:$0xff]   ;;  %v2396_v15 = vcombine.low %v3481_v5, %v3345_v28  ;;  %v2238_v39 = vrot.slane %v3365_v42, 9  ;;  %v973_v44 = vrot.slane %v3369_v43, 5  ;;  %v3506_v18 = vcombine.low %v775_v45, %v789_v59  ;;  %v2948_v43 = vld [vmem:[%s3701_s3 + $0x188] sm:$0xff]   ;;  %v2984_v2 = vld [vmem:[%s3701_s3 + $0x238] sm:$0xff]  }
  0x5d   : > { %2634 = vmatprep.subr.bf16.mxu1 %v2947_v55  ;;  %2717 = vmatpush3.bf16.msra.mxu0 %v2942_v0  ;;  %v962_v19 = vsel %vm3436_vm11, %v2235_v1, %v961_v56  ;;  %v966_v47 = vsel %vm3436_vm11, %v2236_v32, %v965_v37  ;;  %v2256_v51 = vcombine.low %v3472_v38, %v954_v30  ;;  %v2239_v63 = vrot.slane %v3408_v26, 9  ;;  %v2953_v1 = vld [vmem:[%s3701_s3 + $0xa0] sm:$0xff]   ;;  %v2950_v26 = vld [vmem:[%s3701_s3 + $0x190] sm:$0xff]   ;;  %v2960_v30 = vld [vmem:[%s3701_s3 + $0x1b8] sm:$0xff]  }
  0x5e   : > { %2701 = vmatmul.mubr.bf16.gmra.mrb[4].mxu0 %v2317_v41  ;;  %2718 = vmatprep.subr.bf16.mxu0 %v2944_v34  ;;  %v2344_v42 = vcombine.low %v962_v19, %v966_v47  ;;  %v970_v45 = vsel %vm3436_vm11, %v2237_v20, %v969_v33  ;;  %v974_v62 = vsel %vm3436_vm11, %v2238_v39, %v973_v44  ;;  %v977_v54 = vrot.slane %v3412_v60, 5  ;;  %v2955_v60 = vld [vmem:[%s3701_s3 + $0xa8] sm:$0xff]   ;;  %v2957_v56 = vld [vmem:[%s3701_s3 + $0xb0] sm:$0xff]   ;;  %v2967_v37 = vld [vmem:[%s3701_s3 + $0xd8] sm:$0xff]  }
  0x5f   : > { %2720 = vmatprep.mubr.bf16.mxu0 %v2343_v7  ;;  %v2345_v0 = vcombine.low %v970_v45, %v974_v62  ;;  %v3558_v22 = vcombine.low %v3458_v50, %v962_v19  ;;  %v2965_v50 = vld [vmem:[%s3701_s3 + $0xd0] sm:$0xff]   ;;  %v2964_v59 = vld [vmem:[%s3701_s3 + $0x1c8] sm:$0xff]   ;;  %v2969_v7 = vld [vmem:[%s3701_s3 + $0xe0] sm:$0xff]   ;;  %v2371_v11 = vcombine.low %v3398_v8, %v3009_v40 }
  0x60   : > { %2635 = vmatpush3.bf16.msra.mxu1 %v2947_v55  ;;  %v978_v6 = vsel %vm3436_vm11, %v2239_v63, %v977_v54  ;;  %v2956_v55 = vld [vmem:[%s3701_s3 + $0x1a8] sm:$0xff]   ;;  %v2966_v41 = vld [vmem:[%s3701_s3 + $0x1d0] sm:$0xff]   ;;  %v2970_v40 = vld [vmem:[%s3701_s3 + $0x1e0] sm:$0xff]  }
  0x61   : > { %2636 = vmatprep.subr.bf16.mxu1 %v2949_v52  ;;  %2719 = vmatpush3.bf16.msra.mxu0 %v2944_v34  ;;  %v2346_v21 = vcombine.low %v978_v6, %v3464_v16  ;;  %v3566_v34 = vcombine.low %v966_v47, %v970_v45  ;;  %v3576_v32 = vcombine.low %v974_v62, %v978_v6  ;;  %v2972_v20 = vld [vmem:[%s3701_s3 + $0x1e8] sm:$0xff]   ;;  %v2976_v33 = vld [vmem:[%s3701_s3 + $0x1f8] sm:$0xff]   ;;  %v2979_v39 = vld [vmem:[%s3701_s3 + $0x210] sm:$0xff]  }
  0x62   : > { %2728 = vmatprep.subr.bf16.mxu0 %v2946_v27  ;;  %v2175_v16 = vld [vmem:[%s3702_s4] ss:$0 sm:$0xff] }
  0x63   : > { %2629 = vmatmul.mubr.bf16.gmra.mrb[4].mxu1 %v3506_v18 }
  0x64   : > { %2637 = vmatpush3.bf16.msra.mxu1 %v2949_v52  ;;  %2648 = vmatprep.mubr.bf16.mxu1 %v2256_v51  ;;  %v2971_v52 = vld [vmem:[%s3701_s3 + $0xe8] sm:$0xff]  }
  0x65   : > { %2638 = vmatprep.subr.bf16.mxu1 %v2951_v57 }
  0x66   : > { %2721 = vmatmul.mubr.bf16.vlgmr.msra.gmra.mrb[0].mxu0 %v2344_v42 }
  0x67   : > { %2729 = vmatpush3.bf16.msra.mxu0 %v2946_v27  ;;  %2724 = vmatprep.mubr.bf16.mxu0 %v2345_v0  ;;  %v2974_v27 = vld [vmem:[%s3701_s3 + $0x1f0] sm:$0xff]  }
  0x68   : > { %2639 = vmatpush3.bf16.msra.mxu1 %v2951_v57  ;;  %2730 = vmatprep.subr.bf16.mxu0 %v2948_v43 }
  0x69   : > { %2640 = vmatprep.subr.bf16.mxu1 %v2953_v1 }
  0x6b   : > { %2731 = vmatpush3.bf16.msra.mxu0 %v2948_v43 }
  0x6c   : > { %2641 = vmatpush3.bf16.msra.mxu1 %v2953_v1  ;;  %2732 = vmatprep.subr.bf16.mxu0 %v2950_v26 }
  0x6d   : > { %2642 = vmatprep.subr.bf16.mxu1 %v2955_v60 }
  0x6e   : > { %2725 = vmatmul.mubr.bf16.gmra.mrb[4].mxu0 %v2346_v21 }
  0x6f   : > { %2733 = vmatpush3.bf16.msra.mxu0 %v2950_v26  ;;  %2744 = vmatprep.mubr.bf16.mxu0 %v3244_v48  ;;  %v2958_v48 = vld [vmem:[%s3701_s3 + $0x1b0] sm:$0xff]  }
  0x70   : > { %2643 = vmatpush3.bf16.msra.mxu1 %v2955_v60  ;;  %2734 = vmatprep.subr.bf16.mxu0 %v2952_v24 }
  0x71   : > { %2644 = vmatprep.subr.bf16.mxu1 %v2957_v56 }
  0x73   : > { %2735 = vmatpush3.bf16.msra.mxu0 %v2952_v24 }
  0x74   : > { %2645 = vmatpush3.bf16.msra.mxu1 %v2957_v56  ;;  %2736 = vmatprep.subr.bf16.mxu0 %v2954_v10 }
  0x75   : > { %2646 = vmatprep.subr.bf16.mxu1 %v2959_v12 }
  0x77   : > { %2737 = vmatpush3.bf16.msra.mxu0 %v2954_v10 }
  0x78   : > { %2647 = vmatpush3.bf16.msra.mxu1 %v2959_v12  ;;  %2738 = vmatprep.subr.bf16.mxu0 %v2956_v55 }
  0x79   : > { %2656 = vmatprep.subr.bf16.mxu1 %v2961_v29 }
  0x7b   : > { %2649 = vmatmul.mubr.bf16.vlgmr.msra.gmra.mrb[0].mxu1 %v3558_v22  ;;  %2739 = vmatpush3.bf16.msra.mxu0 %v2956_v55 }
  0x7c   : > { %2657 = vmatpush3.bf16.msra.mxu1 %v2961_v29  ;;  %2740 = vmatprep.subr.bf16.mxu0 %v2958_v48 }
  0x7d   : > { %2658 = vmatprep.subr.bf16.mxu1 %v2963_v58  ;;  %2652 = vmatprep.mubr.bf16.mxu1 %v3566_v34 }
  0x7f   : > { %2741 = vmatpush3.bf16.msra.mxu0 %v2958_v48 }
  0x80   : > { %2659 = vmatpush3.bf16.msra.mxu1 %v2963_v58  ;;  %2742 = vmatprep.subr.bf16.mxu0 %v2960_v30 }
  0x81   : > { %2660 = vmatprep.subr.bf16.mxu1 %v2965_v50 }
  0x83   : > { %2653 = vmatmul.mubr.bf16.gmra.mrb[4].mxu1 %v3576_v32  ;;  %2743 = vmatpush3.bf16.msra.mxu0 %v2960_v30 }
  0x84   : > { %2661 = vmatpush3.bf16.msra.mxu1 %v2965_v50  ;;  %2752 = vmatprep.subr.bf16.mxu0 %v2962_v35 }
  0x85   : > { %2662 = vmatprep.subr.bf16.mxu1 %v2967_v37  ;;  %2672 = vmatprep.mubr.bf16.mxu1 %v2284_v17  ;;  %v2977_v17 = vld [vmem:[%s3701_s3 + $0x200] sm:$0xff]  }
  0x86   : > { %2745 = vmatmul.mubr.bf16.vlgmr.msra.gmra.mrb[0].mxu0 %v3333_v14  ;;  %v2973_v14 = vld [vmem:[%s3701_s3 + $0xf0] sm:$0xff]  }
  0x87   : > { %2753 = vmatpush3.bf16.msra.mxu0 %v2962_v35  ;;  %2748 = vmatprep.mubr.bf16.mxu0 %v3404_v23  ;;  %v2975_v23 = vld [vmem:[%s3701_s3 + $0xf8] sm:$0xff]  }
  0x88   : > { %2663 = vmatpush3.bf16.msra.mxu1 %v2967_v37  ;;  %2754 = vmatprep.subr.bf16.mxu0 %v2964_v59 }
  0x89   : > { %2664 = vmatprep.subr.bf16.mxu1 %v2969_v7 }
  0x8b   : > { %2755 = vmatpush3.bf16.msra.mxu0 %v2964_v59 }
  0x8c   : > { %2665 = vmatpush3.bf16.msra.mxu1 %v2969_v7  ;;  %2756 = vmatprep.subr.bf16.mxu0 %v2966_v41 }
  0x8d   : > { %2666 = vmatprep.subr.bf16.mxu1 %v2971_v52 }
  0x8e   : > { %2749 = vmatmul.mubr.bf16.gmra.mrb[4].mxu0 %v2371_v11 }
  0x8f   : > { %2757 = vmatpush3.bf16.msra.mxu0 %v2966_v41  ;;  %2768 = vmatprep.mubr.bf16.mxu0 %v3386_v3  ;;  %v2978_v3 = vld [vmem:[%s3701_s3 + $0x208] sm:$0xff]  }
  0x90   : > { %2667 = vmatpush3.bf16.msra.mxu1 %v2971_v52  ;;  %2758 = vmatprep.subr.bf16.mxu0 %v2968_v13 }
  0x91   : > { %2668 = vmatprep.subr.bf16.mxu1 %v2973_v14 }
  0x93   : > { %2759 = vmatpush3.bf16.msra.mxu0 %v2968_v13 }
  0x94   : > { %2669 = vmatpush3.bf16.msra.mxu1 %v2973_v14  ;;  %2760 = vmatprep.subr.bf16.mxu0 %v2970_v40 }
  0x95   : > { %2670 = vmatprep.subr.bf16.mxu1 %v2975_v23 }
  0x97   : > { %2761 = vmatpush3.bf16.msra.mxu0 %v2970_v40 }
  0x98   : > { %2671 = vmatpush3.bf16.msra.mxu1 %v2975_v23  ;;  %2762 = vmatprep.subr.bf16.mxu0 %v2972_v20 }
  0x99   : > { %2800 = vmatprep.subr.bf16.mxu1 %v2977_v17 }
  0x9b   : > { %2673 = vmatmul.mubr.bf16.vlgmr.msra.gmra.mrb[0].mxu1 %v2285_v49  ;;  %2763 = vmatpush3.bf16.msra.mxu0 %v2972_v20 }
  0x9c   : > { %2808 = vmatpush3.bf16.msra.mxu1 %v2977_v17  ;;  %2764 = vmatprep.subr.bf16.mxu0 %v2974_v27 }
  0x9d   : > { %2801 = vmatprep.subr.bf16.mxu1 %v2978_v3  ;;  %2676 = vmatprep.mubr.bf16.mxu1 %v2286_v31 }
  0x9f   : > { %2765 = vmatpush3.bf16.msra.mxu0 %v2974_v27 }
  0xa0   : > { %2809 = vmatpush3.bf16.msra.mxu1 %v2978_v3  ;;  %2766 = vmatprep.subr.bf16.mxu0 %v2976_v33 }
  0xa1   : > { %2802 = vmatprep.subr.bf16.mxu1 %v2979_v39 }
  0xa3   : > { %2677 = vmatmul.mubr.bf16.gmra.mrb[4].mxu1 %v2287_v4  ;;  %2767 = vmatpush3.bf16.msra.mxu0 %v2976_v33 }
  0xa4   : > { %2810 = vmatpush3.bf16.msra.mxu1 %v2979_v39  ;;  %2776 = vmatprep.subr.bf16.mxu0 %v2977_v17 }
  0xa5   : > { %2803 = vmatprep.subr.bf16.mxu1 %v2980_v25  ;;  %2796 = vmatprep.mubr.bf16.mxu1 %v3576_v32 }
  0xa6   : > { %2769 = vmatmul.mubr.bf16.vlgmr.msra.gmra.mrb[0].mxu0 %v3446_v46 }
  0xa7   : > { %2777 = vmatpush3.bf16.msra.mxu0 %v2977_v17  ;;  %2772 = vmatprep.mubr.bf16.mxu0 %v3506_v18 }
  0xa8   : > { %2778 = vmatprep.subr.bf16.mxu0 %v2978_v3  ;;  %2811 = vmatpush3.bf16.msra.mxu1 %v2980_v25 }
  0xa9   : > { %2804 = vmatprep.subr.bf16.mxu1 %v2981_v53 }
  0xab   : > { %2779 = vmatpush3.bf16.msra.mxu0 %v2978_v3 }
  0xac   : > { %2780 = vmatprep.subr.bf16.mxu0 %v2979_v39  ;;  %2812 = vmatpush3.bf16.msra.mxu1 %v2981_v53 }
  0xad   : > { %2805 = vmatprep.subr.bf16.mxu1 %v2982_v9 }
  0xae   : > { %2773 = vmatmul.mubr.bf16.gmra.mrb[4].mxu0 %v2396_v15 }
  0xaf   : > { %2781 = vmatpush3.bf16.msra.mxu0 %v2979_v39  ;;  %2792 = vmatprep.mubr.bf16.mxu0 %v3558_v22 }
  0xb0   : > { %2782 = vmatprep.subr.bf16.mxu0 %v2980_v25  ;;  %2813 = vmatpush3.bf16.msra.mxu1 %v2982_v9 }
  0xb1   : > { %2806 = vmatprep.subr.bf16.mxu1 %v2983_v36 }
  0xb3   : > { %2783 = vmatpush3.bf16.msra.mxu0 %v2980_v25 }
  0xb4   : > { %2784 = vmatprep.subr.bf16.mxu0 %v2981_v53  ;;  %2814 = vmatpush3.bf16.msra.mxu1 %v2983_v36 }
  0xb5   : > { %2807 = vmatprep.subr.bf16.mxu1 %v2984_v2 }
  0xb7   : > { %2785 = vmatpush3.bf16.msra.mxu0 %v2981_v53 }
  0xb8   : > { %2786 = vmatprep.subr.bf16.mxu0 %v2982_v9  ;;  %2815 = vmatpush3.bf16.msra.mxu1 %v2984_v2 }
  0xbb   : > { %2787 = vmatpush3.bf16.msra.mxu0 %v2982_v9  ;;  %2797 = vmatmul.mubr.bf16.vlgmr.msra.gmra.mrb[8].mxu1 %v2421_v61 }
  0xbc   : > { %2788 = vmatprep.subr.bf16.mxu0 %v2983_v36 }
  0xbf   : > { %2789 = vmatpush3.bf16.msra.mxu0 %v2983_v36 }
  0xc0   : > { %2790 = vmatprep.subr.bf16.mxu0 %v2984_v2 }
  0xc3   : > { %2791 = vmatpush3.bf16.msra.mxu0 %v2984_v2 }
  0xc6   : > { %2793 = vmatmul.mubr.bf16.vlgmr.msra.gmra.mrb[0].mxu0 %v3566_v34 }
 0x16e   : > { %v2674_v28 = vpop.f32.mrb[0].mxu1 }
 0x16f   : > { %v1242_v8 = vpop.f32.mrb[1].mxu1  ;;  %v2816_v10 = vadd.f32 %v2674_v28, %v2175_v16 }
 0x170   : > { %v2675_v46 = vpop.f32.mrb[2].mxu1  ;;  %v2818_v12 = vadd.f32 %v2175_v16, %v1242_v8 }
 0x171   : > { %v1245_v5 = vpop.f32.mrb[3].mxu1  ;;  %v2820_v29 = vadd.f32 %v2675_v46, %v2175_v16 }
 0x172   : > { %v2822_v58 = vadd.f32 %v2175_v16, %v1245_v5 }
 0x176   : > { %v2678_v49 = vpop.f32.mrb[4].mxu1 }
 0x177   : > { %v1258_v31 = vpop.f32.mrb[5].mxu1  ;;  %v2824_v38 = vadd.f32 %v2678_v49, %v2175_v16 }
 0x178   : > { %v2679_v4 = vpop.f32.mrb[6].mxu1  ;;  %v2827_v61 = vadd.f32 %v2175_v16, %v1258_v31 }
 0x179   : > { %v1261_v15 = vpop.f32.mrb[7].mxu1  ;;  %v2830_v44 = vadd.f32 %v2679_v4, %v2175_v16 }
 0x17a   : > { %v2833_v19 = vadd.f32 %v2175_v16, %v1261_v15 }
 0x181   : > { %v2774_v18 = vpop.f32.mrb[4].mxu0 }
 0x182   : > { %v2825_v47 = vadd.f32 %v2824_v38, %v2774_v18  ;;  %v1853_v51 = vpop.f32.mrb[5].mxu0 }
 0x183   : > { %v2828_v57 = vadd.f32 %v2827_v61, %v1853_v51  ;;  %v2775_v42 = vpop.f32.mrb[6].mxu0 }
 0x184   : > { %v2831_v43 = vadd.f32 %v2830_v44, %v2775_v42  ;;  %v1856_v45 = vpop.f32.mrb[7].mxu0 }
 0x185   : > { %v2834_v62 = vadd.f32 %v2833_v19, %v1856_v45 }
 0x18e   : > { %v2798_v63 = vpop.f32.mrb[8].mxu1 }
 0x18f   : > { %v2826_v54 = vadd.f32 %v2825_v47, %v2798_v63  ;;  %v1993_v1 = vpop.f32.mrb[9].mxu1 }
 0x190   : > { %v2829_v0 = vadd.f32 %v2828_v57, %v1993_v1  ;;  %v2799_v6 = vpop.f32.mrb[10].mxu1 }
 0x191   : > { %v2832_v26 = vadd.f32 %v2831_v43, %v2799_v6  ;;  %v1996_v60 = vpop.f32.mrb[11].mxu1  ;;  %v2051_v53 = vmul.f32 %v2826_v54, %v2826_v54 }
 0x192   : > { %v2835_v21 = vadd.f32 %v2834_v62, %v1996_v60  ;;  %v2049_v17 = vmul.f32 %v2829_v0, %v2829_v0 }
 0x193   : > { %v2468_v24 = vpack.c.bf16 %v2832_v26, %v2826_v54  ;;  %v2052_v2 = vmul.f32 %v2832_v26, %v2832_v26 }
 0x194   : > { %v2463_v56 = vpack.c.bf16 %v2835_v21, %v2829_v0  ;;  %v2050_v39 = vmul.f32 %v2835_v21, %v2835_v21 }
 0x195   : > { %2475 = vst [vmem:[%s328_s16 + $0x18] sm:$0xff] %v2468_v24  }
 0x196   : > { %2474 = vst [vmem:[%s328_s16 + $0x10] sm:$0xff] %v2463_v56  }
 0x199   : > { %v2794_v55 = vpop.f32.mrb[0].mxu0 }
 0x19a   : > { %v2817_v22 = vadd.f32 %v2816_v10, %v2794_v55  ;;  %v1977_v48 = vpop.f32.mrb[1].mxu0 }
 0x19b   : > { %v2819_v34 = vadd.f32 %v2818_v12, %v1977_v48  ;;  %v2795_v30 = vpop.f32.mrb[2].mxu0 }
 0x19c   : > { %v2821_v50 = vadd.f32 %v2820_v29, %v2795_v30  ;;  %v1980_v32 = vpop.f32.mrb[3].mxu0  ;;  %v2047_v11 = vmul.f32 %v2817_v22, %v2817_v22 }
 0x19d   : > { %v2823_v35 = vadd.f32 %v2822_v58, %v1980_v32  ;;  %v2045_v59 = vmul.f32 %v2819_v34, %v2819_v34 }
 0x19e   : > { %v2458_v37 = vpack.c.bf16 %v2821_v50, %v2817_v22  ;;  %v2048_v40 = vmul.f32 %v2821_v50, %v2821_v50 }
 0x19f   : > { %v2453_v7 = vpack.c.bf16 %v2823_v35, %v2819_v34  ;;  %v2032_v41 = vadd.f32 %v2823_v35, %v2819_v34  ;;  %v2046_v52 = vmul.f32 %v2823_v35, %v2823_v35 }
 0x1a0   : > { %2473 = vst [vmem:[%s328_s16 + $0x8] sm:$0xff] %v2458_v37  }
 0x1a1   : > { %2454 = vst [vmem:[%s328_s16] sm:$0xff] %v2453_v7   ;;  %v2033_v13 = vadd.f32 %v2817_v22, %v2032_v41  ;;  %v2053_v14 = vadd.f32 %v2046_v52, %v2045_v59 }
 0x1a3   : > { %v2054_v23 = vadd.f32 %v2053_v14, %v2047_v11  ;;  %v2034_v20 = vadd.f32 %v2821_v50, %v2033_v13 }
 0x1a5   : > { %v2035_v27 = vadd.f32 %v2829_v0, %v2034_v20  ;;  %v2055_v3 = vadd.f32 %v2054_v23, %v2048_v40 }
 0x1a7   : > { %v2036_v33 = vadd.f32 %v2835_v21, %v2035_v27  ;;  %v2056_v25 = vadd.f32 %v2055_v3, %v2049_v17 }
 0x1a9   : > { %v2037_v9 = vadd.f32 %v2826_v54, %v2036_v33  ;;  %v2057_v36 = vadd.f32 %v2056_v25, %v2050_v39 }
 0x1ab   : > { %v2038_v28 = vadd.f32 %v2832_v26, %v2037_v9  ;;  %v2058_v8 = vadd.f32 %v2057_v36, %v2051_v53 }
 0x1ad   : > { %v2039_v46 = vrot.slane %v2038_v28, 4  ;;  %v2059_v5 = vadd.f32 %v2058_v8, %v2052_v2 }
 0x1af   : > { %v2040_v49 = vadd.f32 %v2039_v46, %v2038_v28  ;;  %v2060_v31 = vrot.slane %v2059_v5, 4 }
 0x1b1   : > { %v2041_v4 = vrot.slane %v2040_v49, 2  ;;  %v2061_v15 = vadd.f32 %v2060_v31, %v2059_v5 }
 0x1b3   : > { %v2042_v16 = vadd.f32 %v2041_v4, %v2040_v49  ;;  %v2062_v38 = vrot.slane %v2061_v15, 2 }
 0x1b5   : > { %v2043_v61 = vrot.slane %v2042_v16, 1  ;;  %v2063_v44 = vadd.f32 %v2062_v38, %v2061_v15 }
 0x1b7   : > { %v2064_v18 = vrot.slane %v2063_v44, 1  ;;  %v2044_v19 = vadd.f32 %v2043_v61, %v2042_v16 }
 0x1b9   : > { %v2065_v47 = vadd.f32 %v2064_v18, %v2063_v44 }
 0x1bb   : > { %v2067_v51 = vsel %vm460_vm0, %v2044_v19, %v2065_v47 }
 0x1bc   : > { %2068 = vst [vmem:[%s332_s20] sm:$0x3] %v2067_v51 }
 0x1bd PF: > { %p14_p9 = scmp.ge.s32.totalorder %s3062_s25, 4   ;;  %s3713_s21 = smov %s3003_s22 }
 0x1be   : > { %s3714_s22 = smov %s3071_s28  ;;  %s3715_s23 = smov %s3062_s25 }
 0x1bf   :  { %16 = sbr.rel (!%p14_p9) target bundleno = 2 (0x2), region = 136 }

</bundles_post_ra>
